<compile_context>
chip_gen: v5e
topology: v5e:2x2
jax: 0.10.0
libtpu: 0.0.40
codegen_flags: <defaults>
</compile_context>

<pallas_src>
import numpy as np

import jax
import jax.numpy as jnp
from jax.experimental import pallas as pl
from jax.experimental.pallas import tpu as pltpu


# Fixed view-direction table from the PyTorch module.
_V_NP = np.array(
    [
        [1.44337567, 1.44337567, 1.44337567],
        [1.44337567, 1.44337567, -1.44337567],
        [1.44337567, -1.44337567, 1.44337567],
        [1.44337567, -1.44337567, -1.44337567],
        [-1.44337567, 1.44337567, 1.44337567],
        [-1.44337567, 1.44337567, -1.44337567],
        [-1.44337567, -1.44337567, 1.44337567],
        [-1.44337567, -1.44337567, -1.44337567],
        [0.0, 0.89205522, 2.3354309],
        [0.0, 0.89205522, -2.3354309],
        [0.0, -0.89205522, 2.3354309],
        [0.0, -0.89205522, -2.3354309],
        [2.3354309, 0.0, 0.89205522],
        [2.3354309, 0.0, -0.89205522],
        [-2.3354309, 0.0, 0.89205522],
        [-2.3354309, 0.0, -0.89205522],
        [0.89205522, 2.3354309, 0.0],
        [-0.89205522, 2.3354309, 0.0],
        [0.89205522, -2.3354309, 0.0],
        [-0.89205522, -2.3354309, 0.0],
    ],
    dtype=np.float32,
)  # [20, 3]

NUM_VIEWS = _V_NP.shape[0]  # 20


def _round_up(x, m):
    return (x + m - 1) // m * m


# ----------------------------------------------------------------------------
# Pallas kernel: fused normalize -> build 4-channel feat -> MLP R, per N-tile.
# ----------------------------------------------------------------------------
def _featuration_kernel(w1_ref, b1_ref, w2_ref, b2_ref, w3_ref, b3_ref,
                        v_ref, feat_ref, xyz_ref, out_ref):
    f = feat_ref[0]            # [20, TN]  per-view feature, points on lanes
    x = xyz_ref[0]             # [3,  TN]  xyz, points on lanes
    v = v_ref[...]             # [20, 3]   view-direction table (VMEM resident)

    # --- min-max normalization over the 20 views (torch: dim=-1), NaN -> 0 ---
    fmin = jnp.min(f, axis=0, keepdims=True)          # [1, TN] sublane reduce
    fmax = jnp.max(f, axis=0, keepdims=True)
    fn = (f - fmin) / (fmax - fmin)
    fn = jnp.where(jnp.isnan(fn), 0.0, fn)            # feature[isnan] = 0

    # --- per-(view, point) 4-channel input: [f_norm, V - xyz] ---------------
    c = [
        fn,                                           # channel 0
        v[:, 0:1] - x[0:1, :],                        # channel 1: Vx - x
        v[:, 1:2] - x[1:2, :],                        # channel 2: Vy - y
        v[:, 2:3] - x[2:3, :],                        # channel 3: Vz - z
    ]                                                 # each [20, TN]

    def linear(cs, w_ref, b_ref, n_out):
        # nn.Linear layout: w[out, in]; y_j = sum_i w[j, i] * x_i + b[j]
        outs = []
        for j in range(n_out):
            acc = cs[0] * w_ref[j, 0] + b_ref[j]
            for i in range(1, len(cs)):
                acc = acc + cs[i] * w_ref[j, i]
            outs.append(acc)
        return outs

    def leaky_relu(ts):
        return [jnp.where(t >= 0.0, t, 0.2 * t) for t in ts]

    h = leaky_relu(linear(c, w1_ref, b1_ref, 4))
    h = leaky_relu(linear(h, w2_ref, b2_ref, 4))
    out = linear(h, w3_ref, b3_ref, 1)[0]             # [20, TN]

    out_ref[0] = out.astype(out_ref.dtype)


# ----------------------------------------------------------------------------
# Wrapper: layout plumbing (transpose/pad to lane-dense blocks) + pallas_call.
# ----------------------------------------------------------------------------
def featuration_pallas(xyz, feature, params, *, tile_n=512):
    """
    xyz:     [B, N, 3]      point coordinates
    feature: [B, N, 20]     per-view features
    params:  (w1[4,4], b1[4], w2[4,4], b2[4], w3[1,4], b3[1])  (nn.Linear layout)
    returns: [B, N, 20]
    """
    w1, b1, w2, b2, w3, b3 = params
    B, N, _ = xyz.shape
    assert feature.shape == (B, N, NUM_VIEWS)

    # N (points) goes on the lane axis; pad it to a multiple of the tile.
    n_pad = _round_up(max(N, 1), 128)
    tile_n = min(tile_n, n_pad)
    n_pad = _round_up(n_pad, tile_n)
    n_tiles = n_pad // tile_n

    feat_t = jnp.transpose(feature, (0, 2, 1)).astype(jnp.float32)  # [B, 20, N]
    xyz_t = jnp.transpose(xyz, (0, 2, 1)).astype(jnp.float32)       # [B, 3,  N]
    if n_pad != N:
        feat_t = jnp.pad(feat_t, ((0, 0), (0, 0), (0, n_pad - N)))
        xyz_t = jnp.pad(xyz_t, ((0, 0), (0, 0), (0, n_pad - N)))

    v_arr = jnp.asarray(_V_NP)  # [20, 3]

    smem = pl.BlockSpec(memory_space=pltpu.MemorySpace.SMEM)  # whole array, SMEM

    out = pl.pallas_call(
        _featuration_kernel,
        grid=(B, n_tiles),
        in_specs=[
            smem, smem, smem, smem, smem, smem,                       # MLP params
            pl.BlockSpec((NUM_VIEWS, 3), lambda b, t: (0, 0)),        # V (resident)
            pl.BlockSpec((1, NUM_VIEWS, tile_n), lambda b, t: (b, 0, t)),
            pl.BlockSpec((1, 3, tile_n), lambda b, t: (b, 0, t)),
        ],
        out_specs=pl.BlockSpec((1, NUM_VIEWS, tile_n), lambda b, t: (b, 0, t)),
        out_shape=jax.ShapeDtypeStruct((B, NUM_VIEWS, n_pad), jnp.float32),
        compiler_params=pltpu.CompilerParams(
            dimension_semantics=("parallel", "parallel")),
    )(w1, b1, w2, b2, w3, b3, v_arr, feat_t, xyz_t)

    out = out[:, :, :N]                       # strip N padding
    return jnp.transpose(out, (0, 2, 1))      # back to torch layout [B, N, 20]


# ----------------------------------------------------------------------------
# Module wrapper (holds the R-MLP parameters, nn.Linear-style init).
# ----------------------------------------------------------------------------
class FeaturationPallas:
    def __init__(self, key):
        def linear_init(k, fan_in, fan_out):
            k_w, k_b = jax.random.split(k)
            bound = 1.0 / np.sqrt(fan_in)
            w = jax.random.uniform(k_w, (fan_out, fan_in), jnp.float32, -bound, bound)
            b = jax.random.uniform(k_b, (fan_out,), jnp.float32, -bound, bound)
            return w, b

        k1, k2, k3 = jax.random.split(key, 3)
        self.w1, self.b1 = linear_init(k1, 4, 4)
        self.w2, self.b2 = linear_init(k2, 4, 4)
        self.w3, self.b3 = linear_init(k3, 4, 1)

    def params(self):
        return (self.w1, self.b1, self.w2, self.b2, self.w3, self.b3)

    def __call__(self, xyz, feature, *, tile_n=512):
        return featuration_pallas(xyz, feature, self.params(), tile_n=tile_n)


# ----------------------------------------------------------------------------
# Pure-JAX reference (faithful to the PyTorch forward) for correctness check.
# ----------------------------------------------------------------------------
def featuration_ref(xyz, feature, params):
    w1, b1, w2, b2, w3, b3 = params
    v = jnp.asarray(_V_NP)                                     # [20, 3]
    fmin = jnp.min(feature, axis=-1, keepdims=True)
    fmax = jnp.max(feature, axis=-1, keepdims=True)
    fn = (feature - fmin) / (fmax - fmin)
    fn = jnp.where(jnp.isnan(fn), 0.0, fn)                     # [B, N, 20]
    geo = v[None, None, :, :] - xyz[:, :, None, :]             # [B, N, 20, 3]
    feat = jnp.concatenate([fn[..., None], geo], axis=-1)      # [B, N, 20, 4]

    def lrelu(x):
        return jnp.where(x >= 0.0, x, 0.2 * x)

    h = lrelu(feat @ w1.T + b1)
    h = lrelu(h @ w2.T + b2)
    out = h @ w3.T + b3                                        # [B, N, 20, 1]
    return out[..., 0]                                         # flatten(start_dim=2)


# ----------------------------------------------------------------------------
if __name__ == "__main__":
    key = jax.random.PRNGKey(0)
    B, N = 2, 300   # N=300 -> padded to 384, 3 tiles of 128 with tile_n=128

    k_xyz, k_feat, k_params = jax.random.split(key, 3)
    xyz = jax.random.normal(k_xyz, (B, N, 3), jnp.float32)
    feature = jax.random.uniform(k_feat, (B, N, NUM_VIEWS), jnp.float32)

    model = FeaturationPallas(k_params)

    # small tile to exercise the grid / padding path at this toy size;
    # default tile_n=512 is the perf setting for realistic N.
    out = model(xyz, feature, tile_n=128)
    jax.block_until_ready(out)

    assert out.shape == (B, N, NUM_VIEWS)
    ref = featuration_ref(xyz, feature, model.params())
    np.testing.assert_allclose(np.asarray(out), np.asarray(ref), rtol=1e-4, atol=1e-4)

    print("KERNEL_OK")
</pallas_src>

<mosaic_0001>
module attributes {stable_mosaic.version = 11 : i64} {
  func.func @_featuration_kernel(%arg0: i32, %arg1: i32, %arg2: memref<4x4xf32, #tpu.memory_space<smem>>, %arg3: memref<4xf32, #tpu.memory_space<smem>>, %arg4: memref<4x4xf32, #tpu.memory_space<smem>>, %arg5: memref<4xf32, #tpu.memory_space<smem>>, %arg6: memref<1x4xf32, #tpu.memory_space<smem>>, %arg7: memref<1xf32, #tpu.memory_space<smem>>, %arg8: memref<20x3xf32, #tpu.memory_space<vmem>>, %arg9: memref<1x20x128xf32, #tpu.memory_space<vmem>>, %arg10: memref<1x3x128xf32, #tpu.memory_space<vmem>>, %arg11: memref<1x20x128xf32, #tpu.memory_space<vmem>>) attributes {dimension_semantics = [#tpu.dimension_semantics<parallel>, #tpu.dimension_semantics<parallel>], iteration_bounds = array<i64: 2, 3>, scalar_prefetch = 0 : i64, scratch_operands = 0 : i64, tpu.core_type = #tpu.core_type<tc>, window_params = [{transform_indices = @transform_0, window_bounds = array<i64: 4, 4>}, {transform_indices = @transform_1, window_bounds = array<i64: 4>}, {transform_indices = @transform_2, window_bounds = array<i64: 4, 4>}, {transform_indices = @transform_3, window_bounds = array<i64: 4>}, {transform_indices = @transform_4, window_bounds = array<i64: 1, 4>}, {transform_indices = @transform_5, window_bounds = array<i64: 1>}, {pipeline_mode = #tpu.pipeline_mode<synchronous>, transform_indices = @transform_6, window_bounds = array<i64: 20, 3>}, {transform_indices = @transform_7, window_bounds = array<i64: 1, 20, 128>}, {transform_indices = @transform_8, window_bounds = array<i64: 1, 3, 128>}, {transform_indices = @transform_9, window_bounds = array<i64: 1, 20, 128>}]} {
    %c0 = arith.constant 0 : index
    %c0_0 = arith.constant 0 : index
    %c0_1 = arith.constant 0 : index
    %0 = vector.load %arg9[%c0, %c0_0, %c0_1] : memref<1x20x128xf32, #tpu.memory_space<vmem>>, vector<1x20x128xf32>
    %1 = vector.shape_cast %0 : vector<1x20x128xf32> to vector<20x128xf32>
    %c0_2 = arith.constant 0 : index
    %c0_3 = arith.constant 0 : index
    %c0_4 = arith.constant 0 : index
    %2 = vector.load %arg10[%c0_2, %c0_3, %c0_4] : memref<1x3x128xf32, #tpu.memory_space<vmem>>, vector<1x3x128xf32>
    %3 = vector.shape_cast %2 : vector<1x3x128xf32> to vector<3x128xf32>
    %c0_5 = arith.constant 0 : index
    %c0_6 = arith.constant 0 : index
    %4 = vector.load %arg8[%c0_5, %c0_6] : memref<20x3xf32, #tpu.memory_space<vmem>>, vector<20x3xf32>
    %cst = arith.constant dense<0x7F800000> : vector<128xf32>
    %5 = vector.multi_reduction <minimumf>, %1, %cst [0] : vector<20x128xf32> to vector<128xf32>
    %6 = vector.shape_cast %5 : vector<128xf32> to vector<1x128xf32>
    %cst_7 = arith.constant dense<0xFF800000> : vector<128xf32>
    %7 = vector.multi_reduction <maximumf>, %1, %cst_7 [0] : vector<20x128xf32> to vector<128xf32>
    %8 = vector.shape_cast %7 : vector<128xf32> to vector<1x128xf32>
    %9 = vector.broadcast %6 : vector<1x128xf32> to vector<20x128xf32>
    %10 = arith.subf %1, %9 : vector<20x128xf32>
    %11 = arith.subf %8, %6 : vector<1x128xf32>
    %12 = vector.broadcast %11 : vector<1x128xf32> to vector<20x128xf32>
    %13 = arith.divf %10, %12 : vector<20x128xf32>
    %14 = arith.cmpf one, %13, %13 : vector<20x128xf32>
    %cst_8 = arith.constant 0.000000e+00 : f32
    %15 = vector.broadcast %cst_8 : f32 to vector<20x128xf32>
    %16 = arith.select %14, %15, %13 : vector<20x128xi1>, vector<20x128xf32>
    %17 = vector.extract_strided_slice %4 {offsets = [0, 0], sizes = [20, 1], strides = [1, 1]} : vector<20x3xf32> to vector<20x1xf32>
    %18 = vector.extract_strided_slice %3 {offsets = [0, 0], sizes = [1, 128], strides = [1, 1]} : vector<3x128xf32> to vector<1x128xf32>
    %19 = vector.broadcast %17 : vector<20x1xf32> to vector<20x128xf32>
    %20 = vector.broadcast %18 : vector<1x128xf32> to vector<20x128xf32>
    %21 = arith.subf %19, %20 : vector<20x128xf32>
    %22 = vector.extract_strided_slice %4 {offsets = [0, 1], sizes = [20, 1], strides = [1, 1]} : vector<20x3xf32> to vector<20x1xf32>
    %23 = vector.extract_strided_slice %3 {offsets = [1, 0], sizes = [1, 128], strides = [1, 1]} : vector<3x128xf32> to vector<1x128xf32>
    %24 = vector.broadcast %22 : vector<20x1xf32> to vector<20x128xf32>
    %25 = vector.broadcast %23 : vector<1x128xf32> to vector<20x128xf32>
    %26 = arith.subf %24, %25 : vector<20x128xf32>
    %27 = vector.extract_strided_slice %4 {offsets = [0, 2], sizes = [20, 1], strides = [1, 1]} : vector<20x3xf32> to vector<20x1xf32>
    %28 = vector.extract_strided_slice %3 {offsets = [2, 0], sizes = [1, 128], strides = [1, 1]} : vector<3x128xf32> to vector<1x128xf32>
    %29 = vector.broadcast %27 : vector<20x1xf32> to vector<20x128xf32>
    %30 = vector.broadcast %28 : vector<1x128xf32> to vector<20x128xf32>
    %31 = arith.subf %29, %30 : vector<20x128xf32>
    %c0_9 = arith.constant 0 : index
    %c0_10 = arith.constant 0 : index
    %32 = memref.load %arg2[%c0_9, %c0_10] : memref<4x4xf32, #tpu.memory_space<smem>>
    %33 = vector.broadcast %32 : f32 to vector<20x128xf32>
    %34 = arith.mulf %16, %33 : vector<20x128xf32>
    %c0_11 = arith.constant 0 : index
    %35 = memref.load %arg3[%c0_11] : memref<4xf32, #tpu.memory_space<smem>>
    %36 = vector.broadcast %35 : f32 to vector<20x128xf32>
    %37 = arith.addf %34, %36 : vector<20x128xf32>
    %c0_12 = arith.constant 0 : index
    %c1 = arith.constant 1 : index
    %38 = memref.load %arg2[%c0_12, %c1] : memref<4x4xf32, #tpu.memory_space<smem>>
    %39 = vector.broadcast %38 : f32 to vector<20x128xf32>
    %40 = arith.mulf %21, %39 : vector<20x128xf32>
    %41 = arith.addf %37, %40 : vector<20x128xf32>
    %c0_13 = arith.constant 0 : index
    %c2 = arith.constant 2 : index
    %42 = memref.load %arg2[%c0_13, %c2] : memref<4x4xf32, #tpu.memory_space<smem>>
    %43 = vector.broadcast %42 : f32 to vector<20x128xf32>
    %44 = arith.mulf %26, %43 : vector<20x128xf32>
    %45 = arith.addf %41, %44 : vector<20x128xf32>
    %c0_14 = arith.constant 0 : index
    %c3 = arith.constant 3 : index
    %46 = memref.load %arg2[%c0_14, %c3] : memref<4x4xf32, #tpu.memory_space<smem>>
    %47 = vector.broadcast %46 : f32 to vector<20x128xf32>
    %48 = arith.mulf %31, %47 : vector<20x128xf32>
    %49 = arith.addf %45, %48 : vector<20x128xf32>
    %c1_15 = arith.constant 1 : index
    %c0_16 = arith.constant 0 : index
    %50 = memref.load %arg2[%c1_15, %c0_16] : memref<4x4xf32, #tpu.memory_space<smem>>
    %51 = vector.broadcast %50 : f32 to vector<20x128xf32>
    %52 = arith.mulf %16, %51 : vector<20x128xf32>
    %c1_17 = arith.constant 1 : index
    %53 = memref.load %arg3[%c1_17] : memref<4xf32, #tpu.memory_space<smem>>
    %54 = vector.broadcast %53 : f32 to vector<20x128xf32>
    %55 = arith.addf %52, %54 : vector<20x128xf32>
    %c1_18 = arith.constant 1 : index
    %c1_19 = arith.constant 1 : index
    %56 = memref.load %arg2[%c1_18, %c1_19] : memref<4x4xf32, #tpu.memory_space<smem>>
    %57 = vector.broadcast %56 : f32 to vector<20x128xf32>
    %58 = arith.mulf %21, %57 : vector<20x128xf32>
    %59 = arith.addf %55, %58 : vector<20x128xf32>
    %c1_20 = arith.constant 1 : index
    %c2_21 = arith.constant 2 : index
    %60 = memref.load %arg2[%c1_20, %c2_21] : memref<4x4xf32, #tpu.memory_space<smem>>
    %61 = vector.broadcast %60 : f32 to vector<20x128xf32>
    %62 = arith.mulf %26, %61 : vector<20x128xf32>
    %63 = arith.addf %59, %62 : vector<20x128xf32>
    %c1_22 = arith.constant 1 : index
    %c3_23 = arith.constant 3 : index
    %64 = memref.load %arg2[%c1_22, %c3_23] : memref<4x4xf32, #tpu.memory_space<smem>>
    %65 = vector.broadcast %64 : f32 to vector<20x128xf32>
    %66 = arith.mulf %31, %65 : vector<20x128xf32>
    %67 = arith.addf %63, %66 : vector<20x128xf32>
    %c2_24 = arith.constant 2 : index
    %c0_25 = arith.constant 0 : index
    %68 = memref.load %arg2[%c2_24, %c0_25] : memref<4x4xf32, #tpu.memory_space<smem>>
    %69 = vector.broadcast %68 : f32 to vector<20x128xf32>
    %70 = arith.mulf %16, %69 : vector<20x128xf32>
    %c2_26 = arith.constant 2 : index
    %71 = memref.load %arg3[%c2_26] : memref<4xf32, #tpu.memory_space<smem>>
    %72 = vector.broadcast %71 : f32 to vector<20x128xf32>
    %73 = arith.addf %70, %72 : vector<20x128xf32>
    %c2_27 = arith.constant 2 : index
    %c1_28 = arith.constant 1 : index
    %74 = memref.load %arg2[%c2_27, %c1_28] : memref<4x4xf32, #tpu.memory_space<smem>>
    %75 = vector.broadcast %74 : f32 to vector<20x128xf32>
    %76 = arith.mulf %21, %75 : vector<20x128xf32>
    %77 = arith.addf %73, %76 : vector<20x128xf32>
    %c2_29 = arith.constant 2 : index
    %c2_30 = arith.constant 2 : index
    %78 = memref.load %arg2[%c2_29, %c2_30] : memref<4x4xf32, #tpu.memory_space<smem>>
    %79 = vector.broadcast %78 : f32 to vector<20x128xf32>
    %80 = arith.mulf %26, %79 : vector<20x128xf32>
    %81 = arith.addf %77, %80 : vector<20x128xf32>
    %c2_31 = arith.constant 2 : index
    %c3_32 = arith.constant 3 : index
    %82 = memref.load %arg2[%c2_31, %c3_32] : memref<4x4xf32, #tpu.memory_space<smem>>
    %83 = vector.broadcast %82 : f32 to vector<20x128xf32>
    %84 = arith.mulf %31, %83 : vector<20x128xf32>
    %85 = arith.addf %81, %84 : vector<20x128xf32>
    %c3_33 = arith.constant 3 : index
    %c0_34 = arith.constant 0 : index
    %86 = memref.load %arg2[%c3_33, %c0_34] : memref<4x4xf32, #tpu.memory_space<smem>>
    %87 = vector.broadcast %86 : f32 to vector<20x128xf32>
    %88 = arith.mulf %16, %87 : vector<20x128xf32>
    %c3_35 = arith.constant 3 : index
    %89 = memref.load %arg3[%c3_35] : memref<4xf32, #tpu.memory_space<smem>>
    %90 = vector.broadcast %89 : f32 to vector<20x128xf32>
    %91 = arith.addf %88, %90 : vector<20x128xf32>
    %c3_36 = arith.constant 3 : index
    %c1_37 = arith.constant 1 : index
    %92 = memref.load %arg2[%c3_36, %c1_37] : memref<4x4xf32, #tpu.memory_space<smem>>
    %93 = vector.broadcast %92 : f32 to vector<20x128xf32>
    %94 = arith.mulf %21, %93 : vector<20x128xf32>
    %95 = arith.addf %91, %94 : vector<20x128xf32>
    %c3_38 = arith.constant 3 : index
    %c2_39 = arith.constant 2 : index
    %96 = memref.load %arg2[%c3_38, %c2_39] : memref<4x4xf32, #tpu.memory_space<smem>>
    %97 = vector.broadcast %96 : f32 to vector<20x128xf32>
    %98 = arith.mulf %26, %97 : vector<20x128xf32>
    %99 = arith.addf %95, %98 : vector<20x128xf32>
    %c3_40 = arith.constant 3 : index
    %c3_41 = arith.constant 3 : index
    %100 = memref.load %arg2[%c3_40, %c3_41] : memref<4x4xf32, #tpu.memory_space<smem>>
    %101 = vector.broadcast %100 : f32 to vector<20x128xf32>
    %102 = arith.mulf %31, %101 : vector<20x128xf32>
    %103 = arith.addf %99, %102 : vector<20x128xf32>
    %cst_42 = arith.constant 0.000000e+00 : f32
    %104 = vector.broadcast %cst_42 : f32 to vector<20x128xf32>
    %105 = arith.cmpf oge, %49, %104 : vector<20x128xf32>
    %cst_43 = arith.constant 2.000000e-01 : f32
    %106 = vector.broadcast %cst_43 : f32 to vector<20x128xf32>
    %107 = arith.mulf %106, %49 : vector<20x128xf32>
    %108 = arith.select %105, %49, %107 : vector<20x128xi1>, vector<20x128xf32>
    %cst_44 = arith.constant 0.000000e+00 : f32
    %109 = vector.broadcast %cst_44 : f32 to vector<20x128xf32>
    %110 = arith.cmpf oge, %67, %109 : vector<20x128xf32>
    %cst_45 = arith.constant 2.000000e-01 : f32
    %111 = vector.broadcast %cst_45 : f32 to vector<20x128xf32>
    %112 = arith.mulf %111, %67 : vector<20x128xf32>
    %113 = arith.select %110, %67, %112 : vector<20x128xi1>, vector<20x128xf32>
    %cst_46 = arith.constant 0.000000e+00 : f32
    %114 = vector.broadcast %cst_46 : f32 to vector<20x128xf32>
    %115 = arith.cmpf oge, %85, %114 : vector<20x128xf32>
    %cst_47 = arith.constant 2.000000e-01 : f32
    %116 = vector.broadcast %cst_47 : f32 to vector<20x128xf32>
    %117 = arith.mulf %116, %85 : vector<20x128xf32>
    %118 = arith.select %115, %85, %117 : vector<20x128xi1>, vector<20x128xf32>
    %cst_48 = arith.constant 0.000000e+00 : f32
    %119 = vector.broadcast %cst_48 : f32 to vector<20x128xf32>
    %120 = arith.cmpf oge, %103, %119 : vector<20x128xf32>
    %cst_49 = arith.constant 2.000000e-01 : f32
    %121 = vector.broadcast %cst_49 : f32 to vector<20x128xf32>
    %122 = arith.mulf %121, %103 : vector<20x128xf32>
    %123 = arith.select %120, %103, %122 : vector<20x128xi1>, vector<20x128xf32>
    %c0_50 = arith.constant 0 : index
    %c0_51 = arith.constant 0 : index
    %124 = memref.load %arg4[%c0_50, %c0_51] : memref<4x4xf32, #tpu.memory_space<smem>>
    %125 = vector.broadcast %124 : f32 to vector<20x128xf32>
    %126 = arith.mulf %108, %125 : vector<20x128xf32>
    %c0_52 = arith.constant 0 : index
    %127 = memref.load %arg5[%c0_52] : memref<4xf32, #tpu.memory_space<smem>>
    %128 = vector.broadcast %127 : f32 to vector<20x128xf32>
    %129 = arith.addf %126, %128 : vector<20x128xf32>
    %c0_53 = arith.constant 0 : index
    %c1_54 = arith.constant 1 : index
    %130 = memref.load %arg4[%c0_53, %c1_54] : memref<4x4xf32, #tpu.memory_space<smem>>
    %131 = vector.broadcast %130 : f32 to vector<20x128xf32>
    %132 = arith.mulf %113, %131 : vector<20x128xf32>
    %133 = arith.addf %129, %132 : vector<20x128xf32>
    %c0_55 = arith.constant 0 : index
    %c2_56 = arith.constant 2 : index
    %134 = memref.load %arg4[%c0_55, %c2_56] : memref<4x4xf32, #tpu.memory_space<smem>>
    %135 = vector.broadcast %134 : f32 to vector<20x128xf32>
    %136 = arith.mulf %118, %135 : vector<20x128xf32>
    %137 = arith.addf %133, %136 : vector<20x128xf32>
    %c0_57 = arith.constant 0 : index
    %c3_58 = arith.constant 3 : index
    %138 = memref.load %arg4[%c0_57, %c3_58] : memref<4x4xf32, #tpu.memory_space<smem>>
    %139 = vector.broadcast %138 : f32 to vector<20x128xf32>
    %140 = arith.mulf %123, %139 : vector<20x128xf32>
    %141 = arith.addf %137, %140 : vector<20x128xf32>
    %c1_59 = arith.constant 1 : index
    %c0_60 = arith.constant 0 : index
    %142 = memref.load %arg4[%c1_59, %c0_60] : memref<4x4xf32, #tpu.memory_space<smem>>
    %143 = vector.broadcast %142 : f32 to vector<20x128xf32>
    %144 = arith.mulf %108, %143 : vector<20x128xf32>
    %c1_61 = arith.constant 1 : index
    %145 = memref.load %arg5[%c1_61] : memref<4xf32, #tpu.memory_space<smem>>
    %146 = vector.broadcast %145 : f32 to vector<20x128xf32>
    %147 = arith.addf %144, %146 : vector<20x128xf32>
    %c1_62 = arith.constant 1 : index
    %c1_63 = arith.constant 1 : index
    %148 = memref.load %arg4[%c1_62, %c1_63] : memref<4x4xf32, #tpu.memory_space<smem>>
    %149 = vector.broadcast %148 : f32 to vector<20x128xf32>
    %150 = arith.mulf %113, %149 : vector<20x128xf32>
    %151 = arith.addf %147, %150 : vector<20x128xf32>
    %c1_64 = arith.constant 1 : index
    %c2_65 = arith.constant 2 : index
    %152 = memref.load %arg4[%c1_64, %c2_65] : memref<4x4xf32, #tpu.memory_space<smem>>
    %153 = vector.broadcast %152 : f32 to vector<20x128xf32>
    %154 = arith.mulf %118, %153 : vector<20x128xf32>
    %155 = arith.addf %151, %154 : vector<20x128xf32>
    %c1_66 = arith.constant 1 : index
    %c3_67 = arith.constant 3 : index
    %156 = memref.load %arg4[%c1_66, %c3_67] : memref<4x4xf32, #tpu.memory_space<smem>>
    %157 = vector.broadcast %156 : f32 to vector<20x128xf32>
    %158 = arith.mulf %123, %157 : vector<20x128xf32>
    %159 = arith.addf %155, %158 : vector<20x128xf32>
    %c2_68 = arith.constant 2 : index
    %c0_69 = arith.constant 0 : index
    %160 = memref.load %arg4[%c2_68, %c0_69] : memref<4x4xf32, #tpu.memory_space<smem>>
    %161 = vector.broadcast %160 : f32 to vector<20x128xf32>
    %162 = arith.mulf %108, %161 : vector<20x128xf32>
    %c2_70 = arith.constant 2 : index
    %163 = memref.load %arg5[%c2_70] : memref<4xf32, #tpu.memory_space<smem>>
    %164 = vector.broadcast %163 : f32 to vector<20x128xf32>
    %165 = arith.addf %162, %164 : vector<20x128xf32>
    %c2_71 = arith.constant 2 : index
    %c1_72 = arith.constant 1 : index
    %166 = memref.load %arg4[%c2_71, %c1_72] : memref<4x4xf32, #tpu.memory_space<smem>>
    %167 = vector.broadcast %166 : f32 to vector<20x128xf32>
    %168 = arith.mulf %113, %167 : vector<20x128xf32>
    %169 = arith.addf %165, %168 : vector<20x128xf32>
    %c2_73 = arith.constant 2 : index
    %c2_74 = arith.constant 2 : index
    %170 = memref.load %arg4[%c2_73, %c2_74] : memref<4x4xf32, #tpu.memory_space<smem>>
    %171 = vector.broadcast %170 : f32 to vector<20x128xf32>
    %172 = arith.mulf %118, %171 : vector<20x128xf32>
    %173 = arith.addf %169, %172 : vector<20x128xf32>
    %c2_75 = arith.constant 2 : index
    %c3_76 = arith.constant 3 : index
    %174 = memref.load %arg4[%c2_75, %c3_76] : memref<4x4xf32, #tpu.memory_space<smem>>
    %175 = vector.broadcast %174 : f32 to vector<20x128xf32>
    %176 = arith.mulf %123, %175 : vector<20x128xf32>
    %177 = arith.addf %173, %176 : vector<20x128xf32>
    %c3_77 = arith.constant 3 : index
    %c0_78 = arith.constant 0 : index
    %178 = memref.load %arg4[%c3_77, %c0_78] : memref<4x4xf32, #tpu.memory_space<smem>>
    %179 = vector.broadcast %178 : f32 to vector<20x128xf32>
    %180 = arith.mulf %108, %179 : vector<20x128xf32>
    %c3_79 = arith.constant 3 : index
    %181 = memref.load %arg5[%c3_79] : memref<4xf32, #tpu.memory_space<smem>>
    %182 = vector.broadcast %181 : f32 to vector<20x128xf32>
    %183 = arith.addf %180, %182 : vector<20x128xf32>
    %c3_80 = arith.constant 3 : index
    %c1_81 = arith.constant 1 : index
    %184 = memref.load %arg4[%c3_80, %c1_81] : memref<4x4xf32, #tpu.memory_space<smem>>
    %185 = vector.broadcast %184 : f32 to vector<20x128xf32>
    %186 = arith.mulf %113, %185 : vector<20x128xf32>
    %187 = arith.addf %183, %186 : vector<20x128xf32>
    %c3_82 = arith.constant 3 : index
    %c2_83 = arith.constant 2 : index
    %188 = memref.load %arg4[%c3_82, %c2_83] : memref<4x4xf32, #tpu.memory_space<smem>>
    %189 = vector.broadcast %188 : f32 to vector<20x128xf32>
    %190 = arith.mulf %118, %189 : vector<20x128xf32>
    %191 = arith.addf %187, %190 : vector<20x128xf32>
    %c3_84 = arith.constant 3 : index
    %c3_85 = arith.constant 3 : index
    %192 = memref.load %arg4[%c3_84, %c3_85] : memref<4x4xf32, #tpu.memory_space<smem>>
    %193 = vector.broadcast %192 : f32 to vector<20x128xf32>
    %194 = arith.mulf %123, %193 : vector<20x128xf32>
    %195 = arith.addf %191, %194 : vector<20x128xf32>
    %cst_86 = arith.constant 0.000000e+00 : f32
    %196 = vector.broadcast %cst_86 : f32 to vector<20x128xf32>
    %197 = arith.cmpf oge, %141, %196 : vector<20x128xf32>
    %cst_87 = arith.constant 2.000000e-01 : f32
    %198 = vector.broadcast %cst_87 : f32 to vector<20x128xf32>
    %199 = arith.mulf %198, %141 : vector<20x128xf32>
    %200 = arith.select %197, %141, %199 : vector<20x128xi1>, vector<20x128xf32>
    %cst_88 = arith.constant 0.000000e+00 : f32
    %201 = vector.broadcast %cst_88 : f32 to vector<20x128xf32>
    %202 = arith.cmpf oge, %159, %201 : vector<20x128xf32>
    %cst_89 = arith.constant 2.000000e-01 : f32
    %203 = vector.broadcast %cst_89 : f32 to vector<20x128xf32>
    %204 = arith.mulf %203, %159 : vector<20x128xf32>
    %205 = arith.select %202, %159, %204 : vector<20x128xi1>, vector<20x128xf32>
    %cst_90 = arith.constant 0.000000e+00 : f32
    %206 = vector.broadcast %cst_90 : f32 to vector<20x128xf32>
    %207 = arith.cmpf oge, %177, %206 : vector<20x128xf32>
    %cst_91 = arith.constant 2.000000e-01 : f32
    %208 = vector.broadcast %cst_91 : f32 to vector<20x128xf32>
    %209 = arith.mulf %208, %177 : vector<20x128xf32>
    %210 = arith.select %207, %177, %209 : vector<20x128xi1>, vector<20x128xf32>
    %cst_92 = arith.constant 0.000000e+00 : f32
    %211 = vector.broadcast %cst_92 : f32 to vector<20x128xf32>
    %212 = arith.cmpf oge, %195, %211 : vector<20x128xf32>
    %cst_93 = arith.constant 2.000000e-01 : f32
    %213 = vector.broadcast %cst_93 : f32 to vector<20x128xf32>
    %214 = arith.mulf %213, %195 : vector<20x128xf32>
    %215 = arith.select %212, %195, %214 : vector<20x128xi1>, vector<20x128xf32>
    %c0_94 = arith.constant 0 : index
    %c0_95 = arith.constant 0 : index
    %216 = memref.load %arg6[%c0_94, %c0_95] : memref<1x4xf32, #tpu.memory_space<smem>>
    %217 = vector.broadcast %216 : f32 to vector<20x128xf32>
    %218 = arith.mulf %200, %217 : vector<20x128xf32>
    %c0_96 = arith.constant 0 : index
    %219 = memref.load %arg7[%c0_96] : memref<1xf32, #tpu.memory_space<smem>>
    %220 = vector.broadcast %219 : f32 to vector<20x128xf32>
    %221 = arith.addf %218, %220 : vector<20x128xf32>
    %c0_97 = arith.constant 0 : index
    %c1_98 = arith.constant 1 : index
    %222 = memref.load %arg6[%c0_97, %c1_98] : memref<1x4xf32, #tpu.memory_space<smem>>
    %223 = vector.broadcast %222 : f32 to vector<20x128xf32>
    %224 = arith.mulf %205, %223 : vector<20x128xf32>
    %225 = arith.addf %221, %224 : vector<20x128xf32>
    %c0_99 = arith.constant 0 : index
    %c2_100 = arith.constant 2 : index
    %226 = memref.load %arg6[%c0_99, %c2_100] : memref<1x4xf32, #tpu.memory_space<smem>>
    %227 = vector.broadcast %226 : f32 to vector<20x128xf32>
    %228 = arith.mulf %210, %227 : vector<20x128xf32>
    %229 = arith.addf %225, %228 : vector<20x128xf32>
    %c0_101 = arith.constant 0 : index
    %c3_102 = arith.constant 3 : index
    %230 = memref.load %arg6[%c0_101, %c3_102] : memref<1x4xf32, #tpu.memory_space<smem>>
    %231 = vector.broadcast %230 : f32 to vector<20x128xf32>
    %232 = arith.mulf %215, %231 : vector<20x128xf32>
    %233 = arith.addf %229, %232 : vector<20x128xf32>
    %c0_103 = arith.constant 0 : index
    %c0_104 = arith.constant 0 : index
    %c0_105 = arith.constant 0 : index
    %234 = vector.load %arg11[%c0_103, %c0_104, %c0_105] : memref<1x20x128xf32, #tpu.memory_space<vmem>>, vector<1x20x128xf32>
    %235 = vector.shape_cast %234 : vector<1x20x128xf32> to vector<20x128xf32>
    %236 = vector.shape_cast %233 : vector<20x128xf32> to vector<1x20x128xf32>
    tpu.vector_store %arg11[%c0_103, %c0_104, %c0_105], %236 {strides = array<i32>} : memref<1x20x128xf32, #tpu.memory_space<vmem>>, vector<1x20x128xf32>,
    return
  }
  func.func @transform_0(%arg0: i32, %arg1: i32) -> (i32, i32) {
    %c0_i32 = arith.constant 0 : i32
    %c0_i32_0 = arith.constant 0 : i32
    %c0_i32_1 = arith.constant 0 : i32
    return %c0_i32, %c0_i32_0 : i32, i32
  }
  func.func @transform_1(%arg0: i32, %arg1: i32) -> i32 {
    %c0_i32 = arith.constant 0 : i32
    %c0_i32_0 = arith.constant 0 : i32
    return %c0_i32 : i32
  }
  func.func @transform_2(%arg0: i32, %arg1: i32) -> (i32, i32) {
    %c0_i32 = arith.constant 0 : i32
    %c0_i32_0 = arith.constant 0 : i32
    %c0_i32_1 = arith.constant 0 : i32
    return %c0_i32, %c0_i32_0 : i32, i32
  }
  func.func @transform_3(%arg0: i32, %arg1: i32) -> i32 {
    %c0_i32 = arith.constant 0 : i32
    %c0_i32_0 = arith.constant 0 : i32
    return %c0_i32 : i32
  }
  func.func @transform_4(%arg0: i32, %arg1: i32) -> (i32, i32) {
    %c0_i32 = arith.constant 0 : i32
    %c0_i32_0 = arith.constant 0 : i32
    %c0_i32_1 = arith.constant 0 : i32
    return %c0_i32, %c0_i32_0 : i32, i32
  }
  func.func @transform_5(%arg0: i32, %arg1: i32) -> i32 {
    %c0_i32 = arith.constant 0 : i32
    %c0_i32_0 = arith.constant 0 : i32
    return %c0_i32 : i32
  }
  func.func @transform_6(%arg0: i32, %arg1: i32) -> (i32, i32) {
    %c0_i32 = arith.constant 0 : i32
    %c0_i32_0 = arith.constant 0 : i32
    %c0_i32_1 = arith.constant 0 : i32
    return %c0_i32, %c0_i32_0 : i32, i32
  }
  func.func @transform_7(%arg0: i32, %arg1: i32) -> (i32, i32, i32) {
    %c0_i32 = arith.constant 0 : i32
    %c0_i32_0 = arith.constant 0 : i32
    return %arg0, %c0_i32, %arg1 : i32, i32, i32
  }
  func.func @transform_8(%arg0: i32, %arg1: i32) -> (i32, i32, i32) {
    %c0_i32 = arith.constant 0 : i32
    %c0_i32_0 = arith.constant 0 : i32
    return %arg0, %c0_i32, %arg1 : i32, i32, i32
  }
  func.func @transform_9(%arg0: i32, %arg1: i32) -> (i32, i32, i32) {
    %c0_i32 = arith.constant 0 : i32
    %c0_i32_0 = arith.constant 0 : i32
    return %arg0, %c0_i32, %arg1 : i32, i32, i32
  }
}

</mosaic_0001>

<bundles_post_ra>
// kernel: tpu_custom_call.1
= control target key start
LH: loop header
LB: loop body
LE: loop exit
PB: predicated region body
PF: predicated region fallthrough
CT: control target
= control target key end

     0   :  { %s2195_s0 = inlined_call_operand.vmem [shape: f32[4,4], index: 0, kind: input, shape index: {}]   ;;  %s2196_s1 = inlined_call_operand.vmem [shape: f32[4], index: 1, kind: input, shape index: {}]   ;;  %s2197_s2 = inlined_call_operand.vmem [shape: f32[4,4], index: 2, kind: input, shape index: {}]   ;;  %s2198_s3 = inlined_call_operand.vmem [shape: f32[4], index: 3, kind: input, shape index: {}]   ;;  %s2199_s4 = inlined_call_operand.vmem [shape: f32[1,4], index: 4, kind: input, shape index: {}]   ;;  %s2200_s5 = inlined_call_operand.<no memory space> [shape: f32[1], index: 5, kind: input, shape index: {}]   ;;  %s2201_s6 = inlined_call_operand.vmem [shape: f32[20,3], index: 6, kind: input, shape index: {}]   ;;  %s2202_s7 = inlined_call_operand.vmem [shape: f32[2,20,384], index: 7, kind: input, shape index: {}]   ;;  %s2203_s8 = inlined_call_operand.vmem [shape: f32[2,3,384], index: 8, kind: input, shape index: {}]   ;;  %s2204_s9 = inlined_call_operand.vmem [shape: f32[2,20,384], index: 9, kind: output, shape index: {}]  }
   0x1   :  { %2238 = sst [smem:[#allocation57_spill]] %s2195_s0 }
   0x2   :  { %2239 = sst [smem:[#allocation58_spill]] %s2196_s1 }
   0x3   :  { %2240 = sst [smem:[#allocation59_spill]] %s2197_s2 }
   0x4   :  { %2241 = sst [smem:[#allocation60_spill]] %s2198_s3 }
   0x5   :  { %2242 = sst [smem:[#allocation61_spill]] %s2199_s4 }
   0x6   :  { %2243 = sst [smem:[#allocation62_spill]] %s2201_s6 }
   0x7   :  { %2244 = sst [smem:[#allocation63_spill]] %s2202_s7 }
   0x8   :  { %2245 = sst [smem:[#allocation64_spill]] %s2204_s9 }
   0x9   :  { %14 = sst [smem:[#allocation2]] %s2200_s5 }
   0xa   :  { %15 = vsyncpa [#allocation4], 0 }
   0xb   :  { %16 = vsyncpa [#allocation6], 0 }
   0xc   :  { %17 = vsyncpa [#allocation9], 0  ;;  %s1548_s11 = smov 0   ;;  %s1550_s12 = smov 0  }
   0xd   :  { %s1552_s13 = smov 0   ;;  %s1554_s14 = smov 0  }
   0xe   :  { %s1556_s15 = smov 0   ;;  %s1558_s16 = smov 0  }
   0xf   :  { %s1560_s17 = smov 0  }
  0x10 LB: > { %2246 = sst [smem:[#allocation16_spill]] %s1465_s12  ;;  %s1161_s5 = sadd.s32 4294967295, %s1485_s17   ;;  %s1485_s17 = sphi %s1560_s17, %s23_s17   ;;  %s1481_s16 = sphi %s1558_s16, %s2340_s16   ;;  %s1477_s15 = sphi %s1556_s15, %s2339_s15   ;;  %s1473_s14 = sphi %s1554_s14, %s2338_s14   ;;  %s1469_s13 = sphi %s1552_s13, %s2337_s13   ;;  %s1465_s12 = sphi %s1550_s12, %s2336_s12   ;;  %s1461_s11 = sphi %s1548_s11, %s2335_s11  }
  0x11   : > { %2247 = sst [smem:[#allocation17_spill]] %s1469_s13  ;;  %s32_s18 = sadd.s32 1, %s1477_s15 }
  0x12   : > { %2248 = sst [smem:[#allocation18_spill]] %s1473_s14  ;;  %p33_p0 = scmp.ge.s32.totalorder %s32_s18, 3 }
  0x13   : > { %2249 = sst [smem:[#allocation19_spill]] %s1477_s15  ;;  %s35_s19 = sadd.s32 1, %s1481_s16 }
  0x14   : > { %2250 = sst [smem:[#allocation20_spill]] %s1481_s16  ;;  %s191_s20 = sadd.s32 1, %s1465_s12 }
  0x15   : > { %2251 = sst [smem:[#allocation21_spill]] %s1485_s17  ;;  %p198_p1 = scmp.ne.s32.totalorder %s1465_s12, %s1461_s11 }
  0x16   : > { %s2342_s18 = smov (%p33_p0, %s32_s18), 0  ;;  %s2344_s19 = smov (!%p33_p0, %s35_s19), %s1481_s16 }
  0x17   : > { %2252 = sst [smem:[#allocation22_spill]] %s2342_s18  ;;  %s187_s21 = ssub.s32 %s1477_s15, %s2342_s18 }
  0x18   : > { %p199_p2 = scmp.eq.s32.totalorder %s1485_s17, 0  ;;  %p37_p3 = scmp.ge.s32.totalorder %s2344_s19, 2 }
  0x19   : > { %p258_p4 = scmp.eq.s32.totalorder %s1161_s5, 5  ;;  %p1163_p6 = scmp.ge.s32.totalorder %s1485_s17, 1 }
  0x1a   : > { %p1595_p5 = por %p199_p2, %p198_p1  ;;  %s2346_s19 = smov (%p37_p3, %s2344_s19), 0 }
  0x1b   : > { %2254 = sst [smem:[#allocation23_spill]] %s2346_s19  ;;  %p1602_p7 = por %p258_p4, %p198_p1 }
  0x1c   : > { %p271_p8 = scmp.lt.s32.totalorder %s1485_s17, 7  ;;  %s186_s24 = ssub.s32 %s1481_s16, %s2346_s19 }
  0x1d   : > { %s2255_s23 = scalar_select %p1602_p7, 1, 0 }
  0x1e   : > { %s188_s25 = sor.u32 %s187_s21, %s186_s24  ;;  %p1609_p9 = pnand %p1163_p6, %p271_p8 }
  0x1f   : > { %2256 = sst [smem:[#allocation24_spill]] %s2255_s23  ;;  %p189_p10 = scmp.eq.s32.totalorder %s188_s25, 0 }
  0x20   : > { %p1613_p11 = scmp.eq.s32.totalorder %s1161_s5, 0  ;;  %p1245_p12 = pneg %p1609_p9 }
  0x21   : > { %s2259_s1 = sld [smem:[#allocation58_spill]]  ;;  %s1487_s28 = smov [#allocation5]  }
  0x22   : > { %s1623_s10 = scalar_select %p189_p10, %s1465_s12, %s191_s20  }
  0x23   : > { %p1627_p13 = pnand %p1613_p11, %p1245_p12  ;;  %s2262_s3 = sld [smem:[#allocation60_spill]] }
  0x24   : > { %2260 = sst [smem:[#allocation25_spill]] %s1623_s10  ;;  %s1488_s20 = smov [#allocation8]  }
  0x25   : > { %s2263_s0 = sld [smem:[#allocation57_spill]]  ;;  %s1489_s18 = smov [#allocation3]  }
  0x26   : > { %s2264_s2 = sld [smem:[#allocation59_spill]]  ;;  %p1169_p0 = scmp.ge.s32.totalorder %s1485_s17, 6 }
  0x27   : > { %s293_s30 = sshll.u32 %s2259_s1, 4  ;;  %s2265_s4 = sld [smem:[#allocation61_spill]]  ;;  %s294_s30 = int_to_ptr.vmem [resolvable:$true] %s293_s30 }
  0x28   : > { %1251 = dma.vmem_to_smem (!%p1627_p13), %s294_s30, 16, %s1487_s28, [#allocation6]  }
  0x29   : > { %s313_s25 = sshll.u32 %s2262_s3, 4  ;;  %s1490_s28 = smov [#allocation7]   ;;  %s314_s25 = int_to_ptr.vmem [resolvable:$true] %s313_s25 }
  0x2a   : > { %1257 = dma.vmem_to_smem (!%p1627_p13), %s314_s25, 16, %s1488_s20, [#allocation9]  }
  0x2b   : > { %s283_s19 = sshll.u32 %s2263_s0, 4  ;;  %s1491_s25 = smov [#allocation10]   ;;  %s284_s19 = int_to_ptr.vmem [resolvable:$true] %s283_s19 }
  0x2c   : > { %1248 = dma.vmem_to_smem (!%p1627_p13), %s284_s19, 64, %s1489_s18, [#allocation4]  }
  0x2d   : > { %s303_s5 = sshll.u32 %s2264_s2, 4  ;;  %s323_s30 = sshll.u32 %s2265_s4, 4  ;;  %s304_s5 = int_to_ptr.vmem [resolvable:$true] %s303_s5  ;;  %s324_s30 = int_to_ptr.vmem [resolvable:$true] %s323_s30 }
  0x2e   : > { %1254 = dma.vmem_to_smem (!%p1627_p13), %s304_s5, 64, %s1490_s28, [#allocation6]  }
  0x2f   : > { %1260 = dma.vmem_to_smem (!%p1627_p13), %s324_s30, 16, %s1491_s25, [#allocation9]  }
  0x30   : > { %336 = sbr.rel (%p1169_p0) target bundleno = 65 (0x41), region = 44 }
  0x35   : > { %339 = sbr.rel (!%p1595_p5) target bundleno = 65 (0x41), region = 48  ;;  %s341_s1 = sand.u32 (%p1595_p5), 1, %s1465_s12  }
  0x36   : > { %s1221_s9 = smul.u32 (%p1595_p5), 9, %s1481_s16  ;;  %s2266_s7 = sld [smem:[#allocation63_spill]] (%p1595_p5) }
  0x37   : > { %s1220_s3 = smul.u32 (%p1595_p5), 24, %s341_s1 }
  0x38   : > { %s345_s18 = sadd.s32 (%p1595_p5), %s1477_s15, %s1221_s9 }
  0x39   : > { %s1170_s19 = sshll.u32 (%p1595_p5), %s345_s18, 3  ;;  %s343_s21 = scalar_lea.vmem (%p1595_p5), [#allocation11], %s1220_s3 }
  0x3c   : > { %s347_s29 = scalar_lea.vmem %s2266_s7, %s1170_s19 }
  0x3d   : > { %v380_v0 = vld [vmem:[%s347_s29] sm:$0xff]  ;;  %v382_v1 = vld [vmem:[%s347_s29 + $0x18] sm:$0xff]  ;;  %v384_v2 = vld [vmem:[%s347_s29 + $0x30] sm:$0xff] }
  0x3e   : > { %381 = vst [vmem:[%s343_s21] sm:$0xff] %v380_v0 }
  0x3f   : > { %383 = vst [vmem:[%s343_s21 + $0x8] sm:$0xff] %v382_v1 }
  0x40   : > { %385 = vst [vmem:[%s343_s21 + $0x10] sm:$0xff] %v384_v2 }
  0x41 PF: > { %405 = sbr.rel (%p1609_p9) target bundleno = 287 (0x11f), region = 90 }
  0x46   : > { %1448 = dma.done.wait (%p1613_p11), [#allocation4], 64  }
  0x47   : > { %1450 = vsyncadd (%p1613_p11), [#allocation4], 4294967232 }
  0x48   : > { %1452 = dma.done.wait (%p1613_p11), [#allocation6], 80  }
  0x49   : > { %1454 = vsyncadd (%p1613_p11), [#allocation6], 4294967216 }
  0x4a   : > { %1456 = dma.done.wait (%p1613_p11), [#allocation9], 32  }
  0x4b   : > { %1458 = vsyncadd (%p1613_p11), [#allocation9], 4294967264  ;;  %s433_s22 = sand.u32 1, %s1461_s11  }
  0x4c   : > { %s1677_s26 = smul.u32 24, %s433_s22 }
  0x4e   : > { %2267 = sst [smem:[#allocation26_spill]] %s1677_s26  ;;  %s435_s5 = scalar_lea.vmem [#allocation11], %s1677_s26 }
  0x4f   : > { %439 = sfence }
  0x50   : > { %s2268_s6 = sld [smem:[#allocation62_spill]]  ;;  %v1492_v5 = vmov 0   ;;  %v1493_v7 = vmov 1   ;;  %v1494_v8 = vmov 2   ;;  %v1689_v9 = vld [vmem:[%s435_s5] sm:$0xff]  ;;  %v1691_v10 = vld [vmem:[%s435_s5 + $0x8] sm:$0xff] }
  0x51   : > { %1336 = vset.pattern.permute.xlu1 %v1492_v5  ;;  %1335 = vset.pattern.permute.xlu0 %v1492_v5  ;;  %vm491_vm0 = vcmask 1043456   ;;  %v1693_v11 = vld [vmem:[%s435_s5 + $0x10] sm:$0xf]  ;;  %v493_v12 = vmin.f32 %v1689_v9, %v1691_v10  ;;  %v502_v13 = vmax.f32 %v1689_v9, %v1691_v10  ;;  %s1703_s1 = sld [smem:[#allocation3 + $0x2]]  ;;  %p476_p1 = scmp.lt.s32.totalorder %s1473_s14, 1 }
  0x52   : > { %1338 = vset.pattern.permute.xlu2 %v1493_v7  ;;  %v492_v14 = vsel %vm491_vm0, %v1693_v11, inf  ;;  %v501_v15 = vsel %vm491_vm0, %v1693_v11, -inf  ;;  %s1706_s9 = sld [smem:[#allocation3 + $0x82]]  ;;  %p478_p2 = scmp.lt.s32.totalorder %s1469_s13, 2 }
  0x53   : > { %v494_v16 = vmin.f32 %v493_v12, %v492_v14  ;;  %v503_v17 = vmax.f32 %v502_v13, %v501_v15  ;;  %s1710_s3 = sld [smem:[#allocation3 + $0x102]] }
  0x54   : > { %s1712_s18 = sld [smem:[#allocation3 + $0x182]] }
  0x55   : > { %v495_v18 = vrot.slane %v494_v16, 4  ;;  %v504_v19 = vrot.slane %v503_v17, 4  ;;  %s1715_s19 = scalar_select %p476_p1, %s1473_s14, 1 }
  0x56   : > { %v490_v3 = vld [vmem:[%s2268_s6 + $0x10] sm:$0xf]  ;;  %v488_v4 = vld [vmem:[%s2268_s6] sm:$0xff]  ;;  %v489_v6 = vld [vmem:[%s2268_s6 + $0x8] sm:$0xff]  ;;  %s1718_s10 = scalar_select %p478_p2, %s1469_s13, 2 }
  0x57   : > { %549 = vperm.xlu1 %1336, %v490_v3   ;;  %539 = vperm.xlu0 %1335, %v488_v4   ;;  %v496_v20 = vmin.f32 %v494_v16, %v495_v18  ;;  %v505_v21 = vmax.f32 %v503_v17, %v504_v19  ;;  %s1720_s20 = sld [smem:[#allocation3]]  ;;  %s1223_s16 = smul.u32 3, %s1715_s19  ;;  %v1792_v46 = vstv %s1703_s1 }
  0x58   : > { %561 = vperm.xlu2 %1338, %v489_v6   ;;  %s1722_s29 = sld [smem:[#allocation5]]  ;;  %2276 = vst [vmem:[#allocation34_spill] sm:$0xff] %v1792_v46  ;;  %v1808_v52 = vstv %s1706_s9 }
  0x59   : > { %v497_v22 = vrot.slane %v496_v20, 2  ;;  %v506_v23 = vrot.slane %v505_v21, 2  ;;  %s1724_s21 = sld [smem:[#allocation3 + $0x1]]  ;;  %s481_s14 = sadd.s32 %s1223_s16, %s1718_s10  ;;  %2277 = vst [vmem:[#allocation35_spill] sm:$0xff] %v1808_v52  ;;  %v1811_v53 = vstv %s1710_s3 }
  0x5a   : > { %s1726_s22 = sld [smem:[#allocation3 + $0x80]]  ;;  %2278 = vst [vmem:[#allocation36_spill] sm:$0xff] %v1811_v53  ;;  %v1819_v56 = vstv %s1712_s18 }
  0x5b   : > { %v498_v24 = vmin.f32 %v496_v20, %v497_v22  ;;  %v507_v25 = vmax.f32 %v505_v21, %v506_v23  ;;  %s1728_s5 = sld [smem:[#allocation5 + $0x1]]  ;;  %2279 = vst [vmem:[#allocation37_spill] sm:$0xff] %v1819_v56 }
  0x5c   : > { %s1730_s24 = sld [smem:[#allocation3 + $0x81]] }
  0x5d   : > { %v499_v26 = vrot.slane %v498_v24, 1  ;;  %v508_v27 = vrot.slane %v507_v25, 1  ;;  %s1732_s30 = sld [smem:[#allocation3 + $0x100]]  ;;  %v1797_v48 = vstv %s1720_s20 }
  0x5e   : > { %s1734_s28 = sld [smem:[#allocation5 + $0x2]]  ;;  %v1824_v58 = vstv %s1722_s29 }
  0x5f   : > { %1337 = vset.pattern.permute.xlu1 %v1493_v7  ;;  %544 = vperm.xlu0 %1335, %v489_v6   ;;  %v1701_v28 = vmin.f32 %v498_v24, %v499_v26  ;;  %v509_v29 = vmax.f32 %v507_v25, %v508_v27  ;;  %s1736_s25 = sld [smem:[#allocation3 + $0x101]]  ;;  %v1846_v5 = vstv %s1724_s21 }
  0x60   : > { %557 = vperm.xlu1 %1337, %v488_v4   ;;  %565 = vperm.xlu2 %1338, %v490_v3   ;;  %s1738_s27 = sld [smem:[#allocation3 + $0x180]]  ;;  %v1800_v49 = vstv %s1726_s22 }
  0x61   : > { %v513_v30 = vsub.f32 %v509_v29, %v1701_v28  ;;  %s1740_s11 = sld [smem:[#allocation5 + $0x3]]  ;;  %v512_v40 = vsub.f32 %v1693_v11, %v1701_v28  ;;  %v510_v42 = vsub.f32 %v1689_v9, %v1701_v28  ;;  %v1827_v59 = vstv %s1728_s5 }
  0x62   : > { %s1742_s0 = sld [smem:[#allocation3 + $0x181]]  ;;  %v511_v13 = vsub.f32 %v1691_v10, %v1701_v28 }
  0x63   : > { %1342 = vrcp.f32 %v513_v30  ;;  %vm519_vm1 = vweird.f32 %v513_v30  ;;  %v525_v35 = vand.u32 2147483648, %v513_v30  ;;  %s1744_s2 = sld [smem:[#allocation3 + $0x3]]  ;;  %v523_v37 = vand.u32 2147483647, %v513_v30 }
  0x64   : > { %s1746_s4 = sld [smem:[#allocation3 + $0x83]]  ;;  %v1803_v50 = vstv %s1732_s30  ;;  %v1832_v60 = vstv %s1734_s28 }
  0x65   : > { %s1748_s6 = sld [smem:[#allocation3 + $0x103]]  ;;  %v526_v38 = vor.u32 1.1754944e-38, %v525_v35  ;;  %vm524_vm4 = vcmp.eq.f32.partialorder %v523_v37, 8.507059e+37  ;;  %v1858_v9 = vstv %s1736_s25 }
  0x66   : > { %s1750_s7 = sld [smem:[#allocation3 + $0x183]]  ;;  %v1814_v54 = vstv %s1738_s27 }
  0x67   : > { %1339 = vset.pattern.permute.xlu0 %v1494_v8  ;;  %s1753_s15 = sld [smem:[#allocation7]]  ;;  %v1852_v7 = vstv %s1740_s11 }
  0x68   : > { %1340 = vset.pattern.permute.xlu1 %v1494_v8  ;;  %573 = vperm.xlu0 %1339, %v488_v4   ;;  %s1755_s12 = sld [smem:[#allocation8]]  ;;  %v1861_v11 = vstv %s1742_s0 }
  0x69   : > { %577 = vperm.xlu1 %1340, %v489_v6   ;;  %1341 = vset.pattern.permute.xlu2 %v1494_v8  ;;  %v1343_v31 = vpop.eup %1342  ;;  %s1757_s17 = sld [smem:[#allocation7 + $0x1]]  ;;  %v1849_v6 = vstv %s1730_s24  ;;  %v1900_v22 = vstv %s1744_s2 }
  0x6a   : > { %581 = vperm.xlu2 %1341, %v490_v3   ;;  %v515_v32 = vmul.f32 %v1343_v31, %v513_v30  ;;  %vm520_vm2 = vweird.f32 %v1343_v31  ;;  %s1761_s13 = sld [smem:[#allocation7 + $0x2]]  ;;  %2288 = vst [vmem:[#allocation39_spill] sm:$0xff] %v1900_v22  ;;  %v1903_v23 = vstv %s1746_s4 }
  0x6b   : > { %vm521_vm3 = vmor %vm519_vm1, %vm520_vm2  ;;  %s1768_s19 = sld [smem:[#allocation7 + $0x3]]  ;;  %2289 = vst [vmem:[#allocation40_spill] sm:$0xff] %v1903_v23  ;;  %v1906_v24 = vstv %s1748_s6 }
  0x6c   : > { %v516_v33 = vsub.f32 1.0, %v515_v32  ;;  %s1770_s23 = sld [smem:[#allocation7 + $0x80]]  ;;  %2290 = vst [vmem:[#allocation41_spill] sm:$0xff] %v1906_v24  ;;  %v1912_v26 = vstv %s1750_s7 }
  0x6d   : > { %s1772_s26 = sld [smem:[#allocation8 + $0x1]]  ;;  %v1915_v27 = vstv %s1753_s15 }
  0x6e   : > { %v517_v34 = vmul.f32 %v1343_v31, %v516_v33  ;;  %2269 = sst [smem:[#allocation27_spill]] %s1755_s12  ;;  %s1177_s12 = sshll.u32 %s481_s14, 2 }
  0x6f   : > { %2270 = sst [smem:[#allocation28_spill]] %s1757_s17 }
  0x70   : > { %v518_v36 = vadd.f32 %v1343_v31, %v517_v34  ;;  %2271 = sst [smem:[#allocation29_spill]] %s1761_s13 }
  0x71   : > { %2272 = sst [smem:[#allocation30_spill]] %s1768_s19 }
  0x72   : > { %v522_v39 = vsel %vm521_vm3, %v1343_v31, %v518_v36  ;;  %2273 = sst [smem:[#allocation31_spill]] %s1770_s23  ;;  %s483_s23 = scalar_lea.vmem %s2203_s8, %s1177_s12 }
  0x73   : > { %v1764_v41 = vsel %vm524_vm4, %v526_v38, %v522_v39  ;;  %2274 = sst [smem:[#allocation32_spill]] %s1772_s26  ;;  %v487_v47 = vld [vmem:[%s483_s23] sm:$0x7] }
  0x74   : > { %v530_v43 = vmul.f32 %v1764_v41, %v512_v40  ;;  %s1775_s17 = sld [smem:[#allocation7 + $0x81]]  ;;  %v528_v44 = vmul.f32 %v1764_v41, %v510_v42  ;;  %v1821_v57 = vperm.slane %v487_v47, 1  ;;  %v1863_v12 = vperm.slane %v487_v47, 0 }
  0x75   : > { %s1778_s16 = sld [smem:[#allocation7 + $0x82]]  ;;  %v1880_v17 = vperm.slane %v487_v47, 2  ;;  %v529_v28 = vmul.f32 %v1764_v41, %v511_v13 }
  0x76   : > { %s1780_s10 = sld [smem:[#allocation7 + $0x83]]  ;;  %vm533_vm5 = vcmp.ne.f32.partialorder %v530_v43, %v530_v43  ;;  %vm531_vm6 = vcmp.ne.f32.partialorder %v528_v44, %v528_v44 }
  0x77   : > { %s1785_s14 = sld [smem:[#allocation7 + $0x100]]  ;;  %v536_v51 = vsel %vm533_vm5, 0.0, %v530_v43  ;;  %v534_v55 = vsel %vm531_vm6, 0.0, %v528_v44  ;;  %2280 = vst [vmem:[#allocation38_spill] sm:$0xff] %v1880_v17  ;;  %vm532_vm7 = vcmp.ne.f32.partialorder %v529_v28, %v529_v28 }
  0x78   : > { %s1787_s26 = sld [smem:[#allocation8 + $0x2]]  ;;  %v592_v61 = vmul.f32 %v1797_v48, %v536_v51  ;;  %v626_v62 = vmul.f32 %v1800_v49, %v536_v51  ;;  %v660_v63 = vmul.f32 %v1803_v50, %v536_v51  ;;  %v694_v0 = vmul.f32 %v1814_v54, %v536_v51 }
  0x79   : > { %s1794_s13 = sld [smem:[#allocation7 + $0x102]]  ;;  %v590_v1 = vmul.f32 %v1797_v48, %v534_v55  ;;  %v624_v2 = vmul.f32 %v1800_v49, %v534_v55  ;;  %v658_v3 = vmul.f32 %v1803_v50, %v534_v55  ;;  %v692_v8 = vmul.f32 %v1814_v54, %v534_v55 }
  0x7a   : > { %2275 = sst [smem:[#allocation33_spill]] %s1775_s17  ;;  %v1870_v14 = vadd.f32 %v1824_v58, %v592_v61  ;;  %v1873_v15 = vadd.f32 %v1827_v59, %v626_v62  ;;  %v1876_v16 = vadd.f32 %v1832_v60, %v660_v63  ;;  %v1883_v18 = vadd.f32 %v1852_v7, %v694_v0 }
  0x7b   : > { %s1789_s17 = sld [smem:[#allocation7 + $0x101]]  ;;  %v1886_v10 = vadd.f32 %v1824_v58, %v590_v1  ;;  %v1889_v19 = vadd.f32 %v1827_v59, %v624_v2  ;;  %v1892_v20 = vadd.f32 %v1832_v60, %v658_v3  ;;  %v1897_v21 = vadd.f32 %v1852_v7, %v692_v8 }
  0x7c   : > { %s1805_s12 = sld [smem:[#allocation7 + $0x103]]  ;;  %v1942_v36 = vstv %s1778_s16  ;;  %v1945_v37 = vstv %s1780_s10  ;;  %v535_v8 = vsel %vm532_vm7, 0.0, %v529_v28 }
  0x7d   : > { %s1816_s23 = sld [smem:[#allocation7 + $0x180]]  ;;  %v1948_v38 = vstv %s1785_s14 }
  0x7e   : > { %s1829_s1 = sld [smem:[#allocation8 + $0x3]]  ;;  %v1951_v39 = vstv %s1787_s26 }
  0x7f   : > { %s1837_s9 = sld [smem:[#allocation7 + $0x181]]  ;;  %2291 = vst [vmem:[#allocation42_spill] sm:$0xff] %v1951_v39  ;;  %v1960_v42 = vstv %s1794_s13 }
  0x80   : > { %s1843_s3 = sld [smem:[#allocation7 + $0x182]] }
  0x81   : > { %s1855_s18 = sld [smem:[#allocation7 + $0x183]]  ;;  %v1954_v40 = vstv %s1789_s17 }
  0x82   : > { %s1865_s20 = sld [smem:[#allocation10]]  ;;  %v1963_v43 = vstv %s1805_s12 }
  0x83   : > { %s1878_s0 = sld [smem:[#allocation2]]  ;;  %v1976_v61 = vstv %s1816_s23 }
  0x84   : > { %s2281_s29 = sld [smem:[#allocation27_spill]]  ;;  %2296 = vst [vmem:[#allocation47_spill] sm:$0xff] %v1976_v61  ;;  %v1979_v62 = vstv %s1829_s1 }
  0x85   : > { %s2282_s21 = sld [smem:[#allocation28_spill]]  ;;  %2297 = vst [vmem:[#allocation48_spill] sm:$0xff] %v1979_v62  ;;  %v1982_v63 = vstv %s1837_s9 }
  0x86   : > { %s2283_s22 = sld [smem:[#allocation29_spill]]  ;;  %2298 = vst [vmem:[#allocation49_spill] sm:$0xff] %v1982_v63  ;;  %v1985_v0 = vstv %s1843_s3 }
  0x87   : > { %s2284_s5 = sld [smem:[#allocation30_spill]]  ;;  %2299 = vst [vmem:[#allocation50_spill] sm:$0xff] %v1985_v0  ;;  %v1988_v1 = vstv %s1855_s18 }
  0x88   : > { %s2285_s24 = sld [smem:[#allocation31_spill]]  ;;  %2300 = vst [vmem:[#allocation51_spill] sm:$0xff] %v1988_v1  ;;  %v1991_v2 = vstv %s1865_s20 }
  0x89   : > { %s1894_s30 = sld [smem:[#allocation10 + $0x1]]  ;;  %2301 = vst [vmem:[#allocation52_spill] sm:$0xff] %v1991_v2  ;;  %v1995_v13 = vstv %s1878_s0 }
  0x8a   : > { %s2286_s28 = sld [smem:[#allocation32_spill]]  ;;  %v1921_v29 = vstv %s2281_s29  ;;  %2302 = vst [vmem:[#allocation53_spill] sm:$0xff] %v1995_v13 }
  0x8b   : > { %s2287_s25 = sld [smem:[#allocation33_spill]]  ;;  %v1924_v30 = vstv %s2282_s21 }
  0x8c   : > { %s1908_s27 = sld [smem:[#allocation10 + $0x2]]  ;;  %v1927_v31 = vstv %s2283_s22 }
  0x8d   : > { %s1917_s2 = sld [smem:[#allocation10 + $0x3]]  ;;  %v1930_v32 = vstv %s2284_s5 }
  0x8e   : > { %v1933_v33 = vstv %s2285_s24  ;;  %s2327_s4 = sld [smem:[#allocation26_spill]] }
  0x8f   : > { %s2331_s15 = sld [smem:[#allocation18_spill]] (%p1602_p7) }
  0x90   : > { %v1936_v34 = vstv %s2286_s28  ;;  %s2332_s17 = sld [smem:[#allocation17_spill]] (%p1602_p7) }
  0x91   : > { %v1939_v35 = vstv %s2287_s25  ;;  %s2333_s14 = sld [smem:[#allocation64_spill]] (%p1602_p7) }
  0x94   : > { %s2105_s6 = scalar_lea.vmem [#allocation12], %s2327_s4 }
  0x95   : > { %s1224_s26 = smul.u32 (%p1602_p7), 9, %s2331_s15 }
  0x97   : > { %s977_s11 = sadd.s32 (%p1602_p7), %s2332_s17, %s1224_s26 }
  0x98   : > { %s1217_s19 = sshll.u32 (%p1602_p7), %s977_s11, 3 }
  0x99   : > { %s979_s13 = scalar_lea.vmem (%p1602_p7), %s2333_s14, %s1217_s19 }
  0xb2   : > { %v562_v45 = vpop.permute.xlu2 %561 }
  0xb3   : > { %v570_v25 = vsub.f32 %v562_v45, %v1821_v57 }
  0xb5   : > { %v1957_v41 = vmul.f32 %v1792_v46, %v570_v25  ;;  %v1966_v45 = vmul.f32 %v1808_v52, %v570_v25  ;;  %v1969_v47 = vmul.f32 %v1811_v53, %v570_v25  ;;  %v1972_v51 = vmul.f32 %v1819_v56, %v570_v25 }
  0xb6   : > { %v1998_v25 = vstv %s1894_s30 }
  0xb7   : > { %2292 = vst [vmem:[#allocation43_spill] sm:$0xff] %v1957_v41 }
  0xb8   : > { %2293 = vst [vmem:[#allocation44_spill] sm:$0xff] %v1966_v45 }
  0xb9   : > { %2294 = vst [vmem:[#allocation45_spill] sm:$0xff] %v1969_v47 }
  0xba   : > { %v566_v4 = vpop.permute.xlu2 %565  ;;  %2295 = vst [vmem:[#allocation46_spill] sm:$0xff] %v1972_v51  ;;  %v2004_v51 = vstv %s1917_s2 }
  0xbb   : > { %v571_v55 = vsub.f32 %v566_v4, %v1821_v57  ;;  %2303 = vst [vmem:[#allocation54_spill] sm:$0xff] %v1998_v25  ;;  %v2001_v4 = vstv %s1908_s27  ;;  %v659_v25 = vmul.f32 %v1803_v50, %v535_v8 }
  0xbc   : > { %2304 = vst [vmem:[#allocation55_spill] sm:$0xff] %v2001_v4  ;;  %v625_v4 = vmul.f32 %v1800_v49, %v535_v8 }
  0xbd   : > { %2305 = vst [vmem:[#allocation56_spill] sm:$0xff] %v2004_v51  ;;  %v610_v47 = vmul.f32 %v1792_v46, %v571_v55  ;;  %v644_v45 = vmul.f32 %v1808_v52, %v571_v55  ;;  %v678_v41 = vmul.f32 %v1811_v53, %v571_v55  ;;  %v712_v62 = vmul.f32 %v1819_v56, %v571_v55 }
  0xbe   : > { %v693_v53 = vmul.f32 %v1814_v54, %v535_v8  ;;  %v630_v63 = vadd.f32 %v1827_v59, %v625_v4 }
  0xc4   : > { %v582_v44 = vpop.permute.xlu2 %581 }
  0xc5   : > { %v587_v3 = vsub.f32 %v582_v44, %v1880_v17  ;;  %v591_v17 = vmul.f32 %v1797_v48, %v535_v8 }
  0xc7   : > { %v618_v51 = vmul.f32 %v1900_v22, %v587_v3  ;;  %v652_v13 = vmul.f32 %v1903_v23, %v587_v3  ;;  %v686_v22 = vmul.f32 %v1906_v24, %v587_v3  ;;  %v720_v23 = vmul.f32 %v1912_v26, %v587_v3 }
  0xc8   : > { %v596_v0 = vadd.f32 %v1824_v58, %v591_v17 }
  0xc9   : > { %v550_v2 = vpop.permute.xlu1 %549  ;;  %v540_v1 = vpop.permute.xlu0 %539 }
  0xca   : > { %v555_v28 = vsub.f32 %v550_v2, %v1863_v12  ;;  %v553_v44 = vsub.f32 %v540_v1, %v1863_v12 }
  0xcc   : > { %v602_v55 = vmul.f32 %v1846_v5, %v555_v28  ;;  %v636_v56 = vmul.f32 %v1849_v6, %v555_v28  ;;  %v670_v2 = vmul.f32 %v1858_v9, %v555_v28  ;;  %v704_v1 = vmul.f32 %v1861_v11, %v555_v28 }
  0xcd   : > { %v600_v48 = vmul.f32 %v1846_v5, %v553_v44  ;;  %v634_v49 = vmul.f32 %v1849_v6, %v553_v44  ;;  %v668_v46 = vmul.f32 %v1858_v9, %v553_v44  ;;  %v702_v28 = vmul.f32 %v1861_v11, %v553_v44 }
  0xce   : > { %v605_v50 = vadd.f32 %v602_v55, %v1870_v14  ;;  %v639_v54 = vadd.f32 %v636_v56, %v1873_v15  ;;  %v673_v8 = vadd.f32 %v670_v2, %v1876_v16  ;;  %v707_v52 = vadd.f32 %v704_v1, %v1883_v18 }
  0xcf   : > { %v2035_v14 = vadd.f32 %v600_v48, %v1886_v10  ;;  %v2038_v56 = vadd.f32 %v634_v49, %v1889_v19  ;;  %v664_v16 = vadd.f32 %v1832_v60, %v659_v25  ;;  %v698_v18 = vadd.f32 %v1852_v7, %v693_v53  ;;  %v2306_v49 = vld [vmem:[#allocation42_spill] sm:$0xff] }
  0xd0   : > { %v613_v61 = vadd.f32 %v610_v47, %v605_v50  ;;  %v647_v24 = vadd.f32 %v644_v45, %v639_v54  ;;  %v681_v39 = vadd.f32 %v678_v41, %v673_v8  ;;  %v715_v3 = vadd.f32 %v712_v62, %v707_v52  ;;  %v2307_v54 = vld [vmem:[#allocation47_spill] sm:$0xff] }
  0xd1   : > { %v545_v15 = vpop.permute.xlu0 %544  ;;  %v2043_v45 = vadd.f32 %v668_v46, %v1892_v20  ;;  %v2046_v52 = vadd.f32 %v702_v28, %v1897_v21  ;;  %v2308_v28 = vld [vmem:[#allocation49_spill] sm:$0xff] }
  0xd2   : > { %v621_v44 = vadd.f32 %v618_v51, %v613_v61  ;;  %v655_v55 = vadd.f32 %v652_v13, %v647_v24  ;;  %v689_v58 = vadd.f32 %v686_v22, %v681_v39  ;;  %v723_v17 = vadd.f32 %v720_v23, %v715_v3  ;;  %v558_v59 = vpop.permute.xlu1 %557 }
  0xd3   : > { %v554_v10 = vsub.f32 %v545_v15, %v1863_v12  ;;  %v2050_v19 = vsub.f32 %v558_v59, %v1821_v57 }
  0xd4   : > { %vm726_vm8 = vcmp.ge.f32.partialorder %v621_v44, 0.0  ;;  %v729_v60 = vmul.f32 0.2, %v621_v44  ;;  %vm735_vm9 = vcmp.ge.f32.partialorder %v655_v55, 0.0  ;;  %v738_v53 = vmul.f32 0.2, %v655_v55 }
  0xd5   : > { %vm744_vm10 = vcmp.ge.f32.partialorder %v689_v58, 0.0  ;;  %v747_v7 = vmul.f32 0.2, %v689_v58  ;;  %vm753_vm11 = vcmp.ge.f32.partialorder %v723_v17, 0.0  ;;  %v756_v22 = vmul.f32 0.2, %v723_v17 }
  0xd6   : > { %v732_v23 = vsel %vm726_vm8, %v621_v44, %v729_v60  ;;  %v741_v24 = vsel %vm735_vm9, %v655_v55, %v738_v53  ;;  %v601_v46 = vmul.f32 %v1846_v5, %v554_v10  ;;  %v635_v20 = vmul.f32 %v1849_v6, %v554_v10  ;;  %v2309_v44 = vld [vmem:[#allocation50_spill] sm:$0xff] }
  0xd7   : > { %v750_v21 = vsel %vm744_vm10, %v689_v58, %v747_v7  ;;  %v759_v39 = vsel %vm753_vm11, %v723_v17, %v756_v22  ;;  %v764_v12 = vmul.f32 %v1915_v27, %v732_v23  ;;  %v774_v57 = vmul.f32 %v1924_v30, %v741_v24  ;;  %v2310_v58 = vld [vmem:[#allocation51_spill] sm:$0xff]  ;;  %v2311_v7 = vld [vmem:[#allocation48_spill] sm:$0xff] }
  0xd8   : > { %v782_v41 = vmul.f32 %v1927_v31, %v750_v21  ;;  %v790_v47 = vmul.f32 %v1930_v32, %v759_v39  ;;  %v798_v51 = vmul.f32 %v1933_v33, %v732_v23  ;;  %v808_v61 = vmul.f32 %v1939_v35, %v741_v24 }
  0xd9   : > { %v769_v62 = vadd.f32 %v1921_v29, %v764_v12  ;;  %v816_v5 = vmul.f32 %v1942_v36, %v750_v21  ;;  %v824_v6 = vmul.f32 %v1945_v37, %v759_v39  ;;  %v832_v13 = vmul.f32 %v1948_v38, %v732_v23 }
  0xda   : > { %v803_v25 = vadd.f32 %v1936_v34, %v798_v51  ;;  %v842_v4 = vmul.f32 %v1954_v40, %v741_v24  ;;  %v850_v2 = vmul.f32 %v1960_v42, %v750_v21  ;;  %v858_v1 = vmul.f32 %v1963_v43, %v759_v39 }
  0xdb   : > { %v777_v48 = vadd.f32 %v774_v57, %v769_v62  ;;  %v837_v50 = vadd.f32 %v2306_v49, %v832_v13  ;;  %v866_v8 = vmul.f32 %v2307_v54, %v732_v23  ;;  %v876_v3 = vmul.f32 %v2308_v28, %v741_v24  ;;  %v2312_v23 = vld [vmem:[#allocation34_spill] sm:$0xff] }
  0xdc   : > { %v811_v15 = vadd.f32 %v808_v61, %v803_v25  ;;  %v884_v55 = vmul.f32 %v2309_v44, %v750_v21  ;;  %v892_v17 = vmul.f32 %v2310_v58, %v759_v39  ;;  %v604_v59 = vadd.f32 %v601_v46, %v596_v0  ;;  %v2313_v21 = vld [vmem:[#allocation35_spill] sm:$0xff] }
  0xdd   : > { %v785_v60 = vadd.f32 %v782_v41, %v777_v48  ;;  %v845_v53 = vadd.f32 %v842_v4, %v837_v50  ;;  %v871_v22 = vadd.f32 %v2311_v7, %v866_v8  ;;  %v638_v12 = vadd.f32 %v635_v20, %v630_v63 }
  0xde   : > { %v819_v51 = vadd.f32 %v816_v5, %v811_v15  ;;  %v669_v57 = vmul.f32 %v1858_v9, %v554_v10  ;;  %v703_v62 = vmul.f32 %v1861_v11, %v554_v10  ;;  %v608_v13 = vmul.f32 %v2312_v23, %v2050_v19  ;;  %v578_v15 = vpop.permute.xlu1 %577  ;;  %v2320_v23 = vld [vmem:[#allocation38_spill] sm:$0xff] }
  0xdf   : > { %v793_v24 = vadd.f32 %v790_v47, %v785_v60  ;;  %v853_v61 = vadd.f32 %v850_v2, %v845_v53  ;;  %v879_v25 = vadd.f32 %v876_v3, %v871_v22  ;;  %v642_v39 = vmul.f32 %v2313_v21, %v2050_v19  ;;  %v2314_v47 = vld [vmem:[#allocation36_spill] sm:$0xff]  ;;  %v2317_v60 = vld [vmem:[#allocation54_spill] sm:$0xff]  ;;  %v2318_v22 = vld [vmem:[#allocation53_spill] sm:$0xff] }
  0xe0   : > { %v827_v0 = vadd.f32 %v824_v6, %v819_v51  ;;  %v672_v46 = vadd.f32 %v669_v57, %v664_v16  ;;  %v706_v41 = vadd.f32 %v703_v62, %v698_v18  ;;  %v611_v4 = vadd.f32 %v608_v13, %v2035_v14  ;;  %v574_v6 = vpop.permute.xlu0 %573  ;;  %v2315_v18 = vld [vmem:[#allocation52_spill] sm:$0xff]  ;;  %v2319_v51 = vld [vmem:[#allocation55_spill] sm:$0xff] }
  0xe1   : > { %v861_v63 = vadd.f32 %v858_v1, %v853_v61  ;;  %v887_v20 = vadd.f32 %v884_v55, %v879_v25  ;;  %vm898_vm12 = vcmp.ge.f32.partialorder %v793_v24, 0.0  ;;  %v901_v9 = vmul.f32 0.2, %v793_v24  ;;  %v2316_v1 = vld [vmem:[#allocation37_spill] sm:$0xff]  ;;  %v2321_v61 = vld [vmem:[#allocation43_spill] sm:$0xff] }
  0xe2   : > { %vm907_vm13 = vcmp.ge.f32.partialorder %v827_v0, 0.0  ;;  %v910_v11 = vmul.f32 0.2, %v827_v0  ;;  %v645_v10 = vadd.f32 %v642_v39, %v2038_v56  ;;  %v676_v5 = vmul.f32 %v2314_v47, %v2050_v19 }
  0xe3   : > { %v895_v2 = vadd.f32 %v892_v17, %v887_v20  ;;  %v904_v48 = vsel %vm898_vm12, %v793_v24, %v901_v9  ;;  %vm916_vm14 = vcmp.ge.f32.partialorder %v861_v63, 0.0  ;;  %v919_v50 = vmul.f32 0.2, %v861_v63  ;;  %v2324_v20 = vld [vmem:[#allocation39_spill] sm:$0xff] }
  0xe4   : > { %v913_v16 = vsel %vm907_vm13, %v827_v0, %v910_v11  ;;  %v936_v8 = vmul.f32 %v2315_v18, %v904_v48  ;;  %v679_v14 = vadd.f32 %v676_v5, %v2043_v45  ;;  %v710_v3 = vmul.f32 %v2316_v1, %v2050_v19  ;;  %v2322_v19 = vld [vmem:[#allocation44_spill] sm:$0xff]  ;;  %v2326_v5 = vld [vmem:[#allocation41_spill] sm:$0xff] }
  0xe5   : > { %v922_v55 = vsel %vm916_vm14, %v861_v63, %v919_v50  ;;  %vm925_vm15 = vcmp.ge.f32.partialorder %v895_v2, 0.0  ;;  %v928_v56 = vmul.f32 0.2, %v895_v2  ;;  %v946_v53 = vmul.f32 %v2317_v60, %v913_v16  ;;  %v2323_v0 = vld [vmem:[#allocation56_spill] sm:$0xff] }
  0xe6   : > { %v941_v17 = vadd.f32 %v2318_v22, %v936_v8  ;;  %v954_v57 = vmul.f32 %v2319_v51, %v922_v55  ;;  %v713_v62 = vadd.f32 %v710_v3, %v2046_v52  ;;  %v585_v13 = vsub.f32 %v574_v6, %v2320_v23  ;;  %v2325_v11 = vld [vmem:[#allocation40_spill] sm:$0xff] }
  0xe7   : > { %v931_v24 = vsel %vm925_vm15, %v895_v2, %v928_v56  ;;  %v586_v45 = vsub.f32 %v578_v15, %v2320_v23  ;;  %v612_v25 = vadd.f32 %v2321_v61, %v604_v59  ;;  %v646_v21 = vadd.f32 %v2322_v19, %v638_v12  ;;  %v2328_v12 = vld [vmem:[#allocation45_spill] sm:$0xff] }
  0xe8   : > { %v949_v39 = vadd.f32 %v946_v53, %v941_v17  ;;  %v962_v63 = vmul.f32 %v2323_v0, %v931_v24  ;;  %v616_v9 = vmul.f32 %v2324_v20, %v585_v13  ;;  %v650_v47 = vmul.f32 %v2325_v11, %v585_v13 }
  0xe9   : > { %v684_v48 = vmul.f32 %v2326_v5, %v585_v13  ;;  %v718_v52 = vmul.f32 %v1912_v26, %v585_v13  ;;  %v617_v50 = vmul.f32 %v2324_v20, %v586_v45  ;;  %v651_v2 = vmul.f32 %v2325_v11, %v586_v45 }
  0xea   : > { %v957_v6 = vadd.f32 %v954_v57, %v949_v39  ;;  %v619_v59 = vadd.f32 %v616_v9, %v611_v4  ;;  %v653_v16 = vadd.f32 %v650_v47, %v645_v10  ;;  %v680_v8 = vadd.f32 %v2328_v12, %v672_v46 }
  0xeb   : > { %v687_v1 = vadd.f32 %v684_v48, %v679_v14  ;;  %v721_v3 = vadd.f32 %v718_v52, %v713_v62  ;;  %v620_v15 = vadd.f32 %v617_v50, %v612_v25  ;;  %v654_v55 = vadd.f32 %v651_v2, %v646_v21  ;;  %v2329_v14 = vld [vmem:[#allocation46_spill] sm:$0xff] }
  0xec   : > { %v965_v56 = vadd.f32 %v962_v63, %v957_v6  ;;  %vm724_vm0 = vcmp.ge.f32.partialorder %v619_v59, 0.0  ;;  %v727_v53 = vmul.f32 0.2, %v619_v59  ;;  %vm733_vm1 = vcmp.ge.f32.partialorder %v653_v16, 0.0 }
  0xed   : > { %v736_v17 = vmul.f32 0.2, %v653_v16  ;;  %vm742_vm2 = vcmp.ge.f32.partialorder %v687_v1, 0.0  ;;  %v745_v23 = vmul.f32 0.2, %v687_v1  ;;  %vm751_vm3 = vcmp.ge.f32.partialorder %v721_v3, 0.0 }
  0xee   : > { %968 = vst [vmem:[%s2105_s6 + $0x10] sm:$0xf] %v965_v56  ;;  %v730_v4 = vsel %vm724_vm0, %v619_v59, %v727_v53  ;;  %v754_v10 = vmul.f32 0.2, %v721_v3  ;;  %v685_v46 = vmul.f32 %v2326_v5, %v586_v45  ;;  %v714_v57 = vadd.f32 %v2329_v14, %v706_v41 }
  0xef   : > { %v739_v62 = vsel %vm733_vm1, %v653_v16, %v736_v17  ;;  %v748_v13 = vsel %vm742_vm2, %v687_v1, %v745_v23  ;;  %v762_v24 = vmul.f32 %v1915_v27, %v730_v4  ;;  %v796_v61 = vmul.f32 %v1933_v33, %v730_v4 }
  0xf0   : > { %v757_v25 = vsel %vm751_vm3, %v721_v3, %v754_v10  ;;  %v772_v19 = vmul.f32 %v1924_v30, %v739_v62  ;;  %v780_v21 = vmul.f32 %v1927_v31, %v748_v13  ;;  %v806_v39 = vmul.f32 %v1939_v35, %v739_v62 }
  0xf1   : > { %v767_v63 = vadd.f32 %v1921_v29, %v762_v24  ;;  %v788_v20 = vmul.f32 %v1930_v32, %v757_v25  ;;  %v801_v9 = vadd.f32 %v1936_v34, %v796_v61  ;;  %v814_v41 = vmul.f32 %v1942_v36, %v748_v13 }
  0xf2   : > { %v822_v11 = vmul.f32 %v1945_v37, %v757_v25  ;;  %v830_v47 = vmul.f32 %v1948_v38, %v730_v4  ;;  %v840_v5 = vmul.f32 %v1954_v40, %v739_v62  ;;  %v848_v48 = vmul.f32 %v1960_v42, %v748_v13 }
  0xf3   : > { %v775_v52 = vadd.f32 %v772_v19, %v767_v63  ;;  %v809_v50 = vadd.f32 %v806_v39, %v801_v9  ;;  %v856_v2 = vmul.f32 %v1963_v43, %v757_v25  ;;  %v864_v6 = vmul.f32 %v2307_v54, %v730_v4 }
  0xf4   : > { %v835_v59 = vadd.f32 %v2306_v49, %v830_v47  ;;  %v874_v16 = vmul.f32 %v2308_v28, %v739_v62  ;;  %v882_v12 = vmul.f32 %v2309_v44, %v748_v13  ;;  %v890_v1 = vmul.f32 %v2310_v58, %v757_v25 }
  0xf5   : > { %v783_v3 = vadd.f32 %v780_v21, %v775_v52  ;;  %v817_v56 = vadd.f32 %v814_v41, %v809_v50  ;;  %v869_v53 = vadd.f32 %v2311_v7, %v864_v6  ;;  %v688_v17 = vadd.f32 %v685_v46, %v680_v8 }
  0xf6   : > { %v843_v23 = vadd.f32 %v840_v5, %v835_v59  ;;  %v719_v10 = vmul.f32 %v1912_v26, %v586_v45  ;;  %vm725_vm4 = vcmp.ge.f32.partialorder %v620_v15, 0.0  ;;  %v728_v14 = vmul.f32 0.2, %v620_v15 }
  0xf7   : > { %v791_v24 = vadd.f32 %v788_v20, %v783_v3  ;;  %v825_v4 = vadd.f32 %v822_v11, %v817_v56  ;;  %v877_v61 = vadd.f32 %v874_v16, %v869_v53  ;;  %vm734_vm5 = vcmp.ge.f32.partialorder %v654_v55, 0.0 }
  0xf8   : > { %v851_v19 = vadd.f32 %v848_v48, %v843_v23  ;;  %v722_v62 = vadd.f32 %v719_v10, %v714_v57  ;;  %v731_v39 = vsel %vm725_vm4, %v620_v15, %v728_v14  ;;  %v737_v13 = vmul.f32 0.2, %v654_v55 }
  0xf9   : > { %v885_v63 = vadd.f32 %v882_v12, %v877_v61  ;;  %vm896_vm6 = vcmp.ge.f32.partialorder %v791_v24, 0.0  ;;  %v899_v25 = vmul.f32 0.2, %v791_v24  ;;  %vm905_vm7 = vcmp.ge.f32.partialorder %v825_v4, 0.0 }
  0xfa   : > { %v859_v21 = vadd.f32 %v856_v2, %v851_v19  ;;  %v908_v9 = vmul.f32 0.2, %v825_v4  ;;  %v740_v8 = vsel %vm734_vm5, %v654_v55, %v737_v13  ;;  %vm743_vm8 = vcmp.ge.f32.partialorder %v688_v17, 0.0 }
  0xfb   : > { %v893_v46 = vadd.f32 %v890_v1, %v885_v63  ;;  %v902_v26 = vsel %vm896_vm6, %v791_v24, %v899_v25  ;;  %v746_v45 = vmul.f32 0.2, %v688_v17  ;;  %vm752_vm9 = vcmp.ge.f32.partialorder %v722_v62, 0.0 }
  0xfc   : > { %v911_v20 = vsel %vm905_vm7, %v825_v4, %v908_v9  ;;  %vm914_vm10 = vcmp.ge.f32.partialorder %v859_v21, 0.0  ;;  %v917_v41 = vmul.f32 0.2, %v859_v21  ;;  %v934_v11 = vmul.f32 %v2315_v18, %v902_v26 }
  0xfd   : > { %vm923_vm11 = vcmp.ge.f32.partialorder %v893_v46, 0.0  ;;  %v926_v15 = vmul.f32 0.2, %v893_v46  ;;  %v944_v57 = vmul.f32 %v2317_v60, %v911_v20  ;;  %v749_v47 = vsel %vm743_vm8, %v688_v17, %v746_v45 }
  0xfe   : > { %v920_v5 = vsel %vm914_vm10, %v859_v21, %v917_v41  ;;  %v939_v48 = vadd.f32 %v2318_v22, %v934_v11  ;;  %v755_v52 = vmul.f32 0.2, %v722_v62  ;;  %v763_v55 = vmul.f32 %v1915_v27, %v731_v39 }
  0xff   : > { %v929_v50 = vsel %vm923_vm11, %v893_v46, %v926_v15  ;;  %v952_v2 = vmul.f32 %v2319_v51, %v920_v5  ;;  %v773_v12 = vmul.f32 %v1924_v30, %v740_v8  ;;  %v781_v1 = vmul.f32 %v1927_v31, %v749_v47 }
 0x100   : > { %v947_v6 = vadd.f32 %v944_v57, %v939_v48  ;;  %v758_v59 = vsel %vm752_vm9, %v722_v62, %v755_v52  ;;  %v768_v16 = vadd.f32 %v1921_v29, %v763_v55  ;;  %v797_v3 = vmul.f32 %v1933_v33, %v731_v39 }
 0x101   : > { %v960_v53 = vmul.f32 %v2323_v0, %v929_v50  ;;  %v831_v27 = vmul.f32 %v1948_v38, %v731_v39  ;;  %v789_v23 = vmul.f32 %v1930_v32, %v758_v59  ;;  %v807_v14 = vmul.f32 %v1939_v35, %v740_v8 }
 0x102   : > { %v955_v56 = vadd.f32 %v952_v2, %v947_v6  ;;  %v776_v17 = vadd.f32 %v773_v12, %v768_v16  ;;  %v802_v10 = vadd.f32 %v1936_v34, %v797_v3  ;;  %v841_v29 = vmul.f32 %v1954_v40, %v740_v8 }
 0x103   : > { %v836_v31 = vadd.f32 %v2306_v49, %v831_v27  ;;  %v865_v33 = vmul.f32 %v2307_v54, %v731_v39  ;;  %v815_v61 = vmul.f32 %v1942_v36, %v749_v47  ;;  %v849_v19 = vmul.f32 %v1960_v42, %v749_v47 }
 0x104   : > { %v963_v30 = vadd.f32 %v960_v53, %v955_v56  ;;  %v784_v24 = vadd.f32 %v781_v1, %v776_v17  ;;  %v810_v4 = vadd.f32 %v807_v14, %v802_v10  ;;  %v875_v35 = vmul.f32 %v2308_v28, %v740_v8 }
 0x105   : > { %v844_v32 = vadd.f32 %v841_v29, %v836_v31  ;;  %v870_v34 = vadd.f32 %v2311_v7, %v865_v33  ;;  %v823_v40 = vmul.f32 %v1945_v37, %v758_v59  ;;  %v857_v13 = vmul.f32 %v1963_v43, %v758_v59 }
 0x106   : > { %966 = vst [vmem:[%s2105_s6] sm:$0xff] %v963_v30  ;;  %v792_v38 = vadd.f32 %v789_v23, %v784_v24  ;;  %v818_v62 = vadd.f32 %v815_v61, %v810_v4  ;;  %v883_v49 = vmul.f32 %v2309_v44, %v749_v47  ;;  %v891_v21 = vmul.f32 %v2310_v58, %v758_v59 }
 0x107   : > { %v852_v54 = vadd.f32 %v849_v19, %v844_v32  ;;  %v878_v39 = vadd.f32 %v875_v35, %v870_v34 }
 0x108   : > { %vm897_vm12 = vcmp.ge.f32.partialorder %v792_v38, 0.0  ;;  %v900_v36 = vmul.f32 0.2, %v792_v38  ;;  %v826_v63 = vadd.f32 %v823_v40, %v818_v62 }
 0x109   : > { %v860_v42 = vadd.f32 %v857_v13, %v852_v54  ;;  %v886_v25 = vadd.f32 %v883_v49, %v878_v39 }
 0x10a   : > { %v903_v9 = vsel %vm897_vm12, %v792_v38, %v900_v36  ;;  %vm906_vm13 = vcmp.ge.f32.partialorder %v826_v63, 0.0  ;;  %v909_v7 = vmul.f32 0.2, %v826_v63 }
 0x10b   : > { %v935_v28 = vmul.f32 %v2315_v18, %v903_v9  ;;  %v894_v37 = vadd.f32 %v891_v21, %v886_v25  ;;  %vm915_vm14 = vcmp.ge.f32.partialorder %v860_v42, 0.0  ;;  %v918_v43 = vmul.f32 0.2, %v860_v42 }
 0x10c   : > { %v912_v8 = vsel %vm906_vm13, %v826_v63, %v909_v7 }
 0x10d   : > { %v940_v44 = vadd.f32 %v2318_v22, %v935_v28  ;;  %v921_v46 = vsel %vm915_vm14, %v860_v42, %v918_v43  ;;  %vm924_vm15 = vcmp.ge.f32.partialorder %v894_v37, 0.0  ;;  %v927_v26 = vmul.f32 0.2, %v894_v37 }
 0x10e   : > { %v945_v45 = vmul.f32 %v2317_v60, %v912_v8  ;;  %v953_v58 = vmul.f32 %v2319_v51, %v921_v46  ;;  %v1012_v60 = vld [vmem:[%s2105_s6] sm:$0xff] (%p1602_p7)  ;;  %v1016_v51 = vld [vmem:[%s2105_s6 + $0x10] sm:$0xff] (%p1602_p7) }
 0x10f   : > { %v930_v20 = vsel %vm924_vm15, %v894_v37, %v927_v26  ;;  %1013 = vst [vmem:[%s979_s13] sm:$0xff] (%p1602_p7), %v1012_v60 }
 0x110   : > { %v948_v41 = vadd.f32 %v945_v45, %v940_v44  ;;  %v961_v15 = vmul.f32 %v2323_v0, %v930_v20  ;;  %1017 = vst [vmem:[%s979_s13 + $0x30] sm:$0xff] (%p1602_p7), %v1016_v51 }
 0x112   : > { %v956_v11 = vadd.f32 %v953_v58, %v948_v41  ;;  %975 = sbr.rel (!%p1602_p7) target bundleno = 287 (0x11f), region = 118 }
 0x114   : > { %v964_v18 = vadd.f32 %v961_v15, %v956_v11 }
 0x116   : > { %967 = vst [vmem:[%s2105_s6 + $0x8] sm:$0xff] %v964_v18 }
 0x11d   : > { %v1014_v22 = vld [vmem:[%s2105_s6 + $0x8] sm:$0xff] }
 0x11e   : > { %1015 = vst [vmem:[%s979_s13 + $0x18] sm:$0xff] %v1014_v22 }
 0x11f PF: > { %s2334_s12 = sld [smem:[#allocation21_spill]] }
 0x120   : > { %s2335_s11 = sld [smem:[#allocation16_spill]] }
 0x121   : > { %s2337_s13 = sld [smem:[#allocation19_spill]] }
 0x122   : > { %s2338_s14 = sld [smem:[#allocation20_spill]] }
 0x123   : > { %s2339_s15 = sld [smem:[#allocation22_spill]] }
 0x124   : > { %s2340_s16 = sld [smem:[#allocation23_spill]] }
 0x125   : > { %s23_s17 = sadd.s32 1, %s2334_s12   ;;  %s2336_s12 = sld [smem:[#allocation25_spill]] }
 0x126   : > { %p20_p3 = scmp.ge.s32.totalorder %s23_s17, 8  }
 0x128   :  { %22 = sbr.rel (!%p20_p3) target bundleno = 16 (0x10), region = 191 }
 0x12d   :  { %1033 = vsyncpa [#allocation4], 1 }
 0x12e   :  { %1035 = vsyncpa [#allocation4 + $0x1], 1 }
 0x12f   :  { %1036 = vsyncpa [#allocation6], 1 }
 0x130   :  { %1037 = vsyncpa [#allocation9], 1 }

</bundles_post_ra>
